<compile_context>
chip_gen: v6e
topology: v6e:2x2x1
jax: 0.10.0
libtpu: 0.0.40
codegen_flags: <defaults>
</compile_context>

<pallas_src>
import jax
import jax.numpy as jnp
from jax import lax
from jax.experimental import pallas as pl
from jax.experimental.pallas import tpu as pltpu

_EPS = 1e-5       # nn.GroupNorm default eps
_SLOPE = 0.1      # LeakyReLU negative_slope


def _leaky_relu(x):
    # slope < 1  =>  leaky_relu(x) == max(x, slope * x)
    return jnp.maximum(x, _SLOPE * x)


def init_params(key, dim=16):
    """Deterministic parameters matching the FB module's parameter shapes.

    (Scales are slightly larger than the module's std=0.01 init purely so the
    correctness check is numerically well-conditioned; forward math is identical.)
    """
    in_dim = 2 * dim
    ks = jax.random.split(key, 8)
    std = 0.05
    return dict(
        # shuffle_conv: torch shape (dim, 2, 1, 1, 1) -> (dim, 2), init [ones, zeros]
        w_shuffle=jnp.concatenate(
            [jnp.ones((dim, 1), jnp.float32), jnp.zeros((dim, 1), jnp.float32)], axis=1),
        w1=std * jax.random.normal(ks[0], (in_dim, in_dim), jnp.float32),
        b1=std * jax.random.normal(ks[1], (in_dim,), jnp.float32),
        g1=1.0 + std * jax.random.normal(ks[2], (in_dim,), jnp.float32),
        beta1=std * jax.random.normal(ks[3], (in_dim,), jnp.float32),
        w2=std * jax.random.normal(ks[4], (dim, in_dim), jnp.float32),
        b2=std * jax.random.normal(ks[5], (dim,), jnp.float32),
        g2=1.0 + std * jax.random.normal(ks[6], (dim,), jnp.float32),
        beta2=std * jax.random.normal(ks[7], (dim,), jnp.float32),
    )


def _query_vmem_limit():
    phys_vmem = 64 * 1024 * 1024
    try:
        info = pltpu.get_tpu_info()
        phys_vmem = int(getattr(info, "vmem_capacity_bytes", phys_vmem))
    except Exception:
        pass
    # ~75% of physical, capped at 100 MiB: ~48 MiB on v7x, ~96 MiB on v5e/v6e.
    return min((phys_vmem * 3) // 4, 100 * 1024 * 1024)


def _pick_batch_block(b, dim, S, vmem_limit_bytes):
    """How many samples to process per grid step (amortize ~0.35 us step cost)."""
    bytes_per_sample_io = 3 * dim * S * 4                 # f1 + f2 + out tiles
    desired = max(1, -(-(512 * 1024) // bytes_per_sample_io))
    if b >= 2:
        # Keep at least 2 grid steps so megacore parts (v7x) can split the batch.
        desired = min(desired, b // 2)
    # VMEM guard: double-buffered I/O + per-sample intermediates must fit.
    bytes_per_sample_resident = (6 * dim + 160) * S * 4
    max_fit = max(1, int(0.5 * vmem_limit_bytes) // max(1, bytes_per_sample_resident))
    desired = max(1, min(desired, max_fit, b))
    for cand in range(desired, 0, -1):                    # largest divisor of b
        if b % cand == 0:
            return cand
    return 1


def fb_forward(f1, f2, params):
    """f1, f2: (b, dim, D, H, W) float32 -> (b, dim, D, H, W)."""
    b, dim, D, H, W = f1.shape
    in_dim = 2 * dim
    S = D * H * W
    inv_S = 1.0 / float(S)

    # Free reshapes: native layout already has channels on sublanes, spatial last.
    f1r = f1.reshape(b, dim, S)
    f2r = f2.reshape(b, dim, S)

    # Fold the 'b (n c) -> b (c n)' interleave into conv1's weight columns, and the
    # grouped shuffle-conv skip onto the MXU by appending diag(ws) rows:
    #   rows [0:in_dim]        -> conv1 pre-activations
    #   rows [in_dim:in_dim+dim] -> skip = ws0*f1 + ws1*f2
    w1 = params["w1"]                                      # acts on interleaved input
    ws = params["w_shuffle"]                               # (dim, 2)
    W1A = jnp.concatenate([w1[:, 0::2], jnp.diag(ws[:, 0])], axis=0)  # (in_dim+dim, dim)
    W1B = jnp.concatenate([w1[:, 1::2], jnp.diag(ws[:, 1])], axis=0)  # (in_dim+dim, dim)
    W2 = params["w2"]                                      # (dim, in_dim)
    # NOTE: conv biases b1/b2 are exactly cancelled by the GroupNorm mean
    # subtraction, so the kernel never loads them.
    n1 = jnp.stack([params["g1"], params["beta1"]], axis=1)   # (in_dim, 2)
    n2 = jnp.stack([params["g2"], params["beta2"]], axis=1)   # (dim, 2)

    vmem_limit = _query_vmem_limit()
    B_blk = _pick_batch_block(b, dim, S, vmem_limit)

    def kernel(f1_ref, f2_ref, w1a_ref, w1b_ref, w2_ref, n1_ref, n2_ref, out_ref):
        w1a = w1a_ref[...]
        w1b = w1b_ref[...]
        w2 = w2_ref[...]
        g1, be1 = n1_ref[:, 0:1], n1_ref[:, 1:2]
        g2, be2 = n2_ref[:, 0:1], n2_ref[:, 1:2]

        def channel_norm_lrelu(y, g, be):
            # Single-pass per-channel stats + fused FMA normalize + LeakyReLU.
            s = jnp.sum(y, axis=1, keepdims=True)
            q = jnp.sum(y * y, axis=1, keepdims=True)
            m = s * inv_S
            v = jnp.maximum(q * inv_S - m * m, 0.0)
            a = g * lax.rsqrt(v + _EPS)
            c = be - m * a
            return _leaky_relu(y * a + c)

        for i in range(B_blk):                              # static unrolled loop
            f1i = f1_ref[i]                                 # (dim, S)
            f2i = f2_ref[i]
            yfull = (jnp.dot(w1a, f1i, preferred_element_type=jnp.float32)
                     + jnp.dot(w1b, f2i, preferred_element_type=jnp.float32))
            y1 = yfull[:in_dim]                             # (in_dim, S)
            skip = yfull[in_dim:]                           # (dim, S)
            h1 = channel_norm_lrelu(y1, g1, be1)
            y2 = jnp.dot(w2, h1, preferred_element_type=jnp.float32)
            h2 = channel_norm_lrelu(y2, g2, be2)
            out_ref[i] = (skip + h2).astype(out_ref.dtype)

    def full_spec(arr):
        nd = arr.ndim
        return pl.BlockSpec(arr.shape, lambda i, _nd=nd: (0,) * _nd)

    sample_spec = pl.BlockSpec((B_blk, dim, S), lambda i: (i, 0, 0))

    out = pl.pallas_call(
        kernel,
        out_shape=jax.ShapeDtypeStruct((b, dim, S), jnp.float32),
        grid=(b // B_blk,),
        in_specs=[sample_spec, sample_spec,
                  full_spec(W1A), full_spec(W1B), full_spec(W2),
                  full_spec(n1), full_spec(n2)],
        out_specs=pl.BlockSpec((B_blk, dim, S), lambda i: (i, 0, 0)),
        compiler_params=pltpu.CompilerParams(
            dimension_semantics=("parallel",),
            vmem_limit_bytes=vmem_limit,
        ),
    )(f1r, f2r, W1A, W1B, W2, n1, n2)

    return out.reshape(b, dim, D, H, W)


def fb_ref(f1, f2, params):
    """Pure-JAX reference following the PyTorch forward literally (incl. biases)."""
    b, dim, D, H, W = f1.shape
    in_dim = 2 * dim
    S = D * H * W

    # cat + rearrange 'b (n c) D h w -> b (c n) D h w' (n=2) == channel interleave
    f = jnp.stack([f1, f2], axis=2).reshape(b, in_dim, D, H, W)
    x = f.reshape(b, in_dim, S)

    # grouped shuffle conv (groups=dim, 2 in-channels per group, weight (dim, 2))
    fg = f.reshape(b, dim, 2, S)
    skip = jnp.einsum('bgns,gn->bgs', fg, params["w_shuffle"])

    def cn(y, g, be):
        m = jnp.mean(y, axis=2, keepdims=True)
        v = jnp.mean((y - m) ** 2, axis=2, keepdims=True)
        return (y - m) / jnp.sqrt(v + _EPS) * g[None, :, None] + be[None, :, None]

    y1 = jnp.einsum('oc,bcs->bos', params["w1"], x) + params["b1"][None, :, None]
    y1 = cn(y1, params["g1"], params["beta1"])
    y1 = jnp.maximum(y1, _SLOPE * y1)
    y2 = jnp.einsum('oc,bcs->bos', params["w2"], y1) + params["b2"][None, :, None]
    y2 = cn(y2, params["g2"], params["beta2"])
    y2 = jnp.maximum(y2, _SLOPE * y2)
    return (skip + y2).reshape(b, dim, D, H, W)


if __name__ == "__main__":
    key = jax.random.PRNGKey(0)
    k1, k2, kp = jax.random.split(key, 3)

    dim = 16                       # module default: in_dim = 2*dim = 32
    b, D, H, W = 2, 4, 16, 16      # small shapes; S = D*H*W = 1024 (lane-dense)
    f1 = jax.random.normal(k1, (b, dim, D, H, W), jnp.float32)
    f2 = jax.random.normal(k2, (b, dim, D, H, W), jnp.float32)
    params = init_params(kp, dim=dim)

    out = fb_forward(f1, f2, params)
    out = jax.block_until_ready(out)

    ref = fb_ref(f1, f2, params)
    assert out.shape == (b, dim, D, H, W)
    assert jnp.allclose(out, ref, atol=1e-4, rtol=1e-4), \
        float(jnp.max(jnp.abs(out - ref)))

    print("KERNEL_OK")
</pallas_src>

<mosaic_0001>
module attributes {stable_mosaic.version = 11 : i64} {
  func.func @kernel(%arg0: i32, %arg1: memref<1x16x1024xf32, #tpu.memory_space<vmem>>, %arg2: memref<1x16x1024xf32, #tpu.memory_space<vmem>>, %arg3: memref<48x16xf32, #tpu.memory_space<vmem>>, %arg4: memref<48x16xf32, #tpu.memory_space<vmem>>, %arg5: memref<16x32xf32, #tpu.memory_space<vmem>>, %arg6: memref<32x2xf32, #tpu.memory_space<vmem>>, %arg7: memref<16x2xf32, #tpu.memory_space<vmem>>, %arg8: memref<1x16x1024xf32, #tpu.memory_space<vmem>>) attributes {dimension_semantics = [#tpu.dimension_semantics<parallel>], iteration_bounds = array<i64: 2>, scalar_prefetch = 0 : i64, scratch_operands = 0 : i64, tpu.core_type = #tpu.core_type<tc>, window_params = [{transform_indices = @transform_0, window_bounds = array<i64: 1, 16, 1024>}, {transform_indices = @transform_1, window_bounds = array<i64: 1, 16, 1024>}, {pipeline_mode = #tpu.pipeline_mode<synchronous>, transform_indices = @transform_2, window_bounds = array<i64: 48, 16>}, {pipeline_mode = #tpu.pipeline_mode<synchronous>, transform_indices = @transform_3, window_bounds = array<i64: 48, 16>}, {pipeline_mode = #tpu.pipeline_mode<synchronous>, transform_indices = @transform_4, window_bounds = array<i64: 16, 32>}, {pipeline_mode = #tpu.pipeline_mode<synchronous>, transform_indices = @transform_5, window_bounds = array<i64: 32, 2>}, {pipeline_mode = #tpu.pipeline_mode<synchronous>, transform_indices = @transform_6, window_bounds = array<i64: 16, 2>}, {transform_indices = @transform_7, window_bounds = array<i64: 1, 16, 1024>}]} {
    %c0 = arith.constant 0 : index
    %c0_0 = arith.constant 0 : index
    %0 = vector.load %arg3[%c0, %c0_0] : memref<48x16xf32, #tpu.memory_space<vmem>>, vector<48x16xf32>
    %c0_1 = arith.constant 0 : index
    %c0_2 = arith.constant 0 : index
    %1 = vector.load %arg4[%c0_1, %c0_2] : memref<48x16xf32, #tpu.memory_space<vmem>>, vector<48x16xf32>
    %c0_3 = arith.constant 0 : index
    %c0_4 = arith.constant 0 : index
    %2 = vector.load %arg5[%c0_3, %c0_4] : memref<16x32xf32, #tpu.memory_space<vmem>>, vector<16x32xf32>
    %c0_5 = arith.constant 0 : index
    %c0_6 = arith.constant 0 : index
    %3 = vector.load %arg6[%c0_5, %c0_6] : memref<32x2xf32, #tpu.memory_space<vmem>>, vector<32x1xf32>
    %c0_7 = arith.constant 0 : index
    %c1 = arith.constant 1 : index
    %4 = vector.load %arg6[%c0_7, %c1] : memref<32x2xf32, #tpu.memory_space<vmem>>, vector<32x1xf32>
    %c0_8 = arith.constant 0 : index
    %c0_9 = arith.constant 0 : index
    %5 = vector.load %arg7[%c0_8, %c0_9] : memref<16x2xf32, #tpu.memory_space<vmem>>, vector<16x1xf32>
    %c0_10 = arith.constant 0 : index
    %c1_11 = arith.constant 1 : index
    %6 = vector.load %arg7[%c0_10, %c1_11] : memref<16x2xf32, #tpu.memory_space<vmem>>, vector<16x1xf32>
    %c0_12 = arith.constant 0 : index
    %c0_13 = arith.constant 0 : index
    %c0_14 = arith.constant 0 : index
    %7 = vector.load %arg1[%c0_12, %c0_13, %c0_14] : memref<1x16x1024xf32, #tpu.memory_space<vmem>>, vector<1x16x1024xf32>
    %8 = vector.shape_cast %7 : vector<1x16x1024xf32> to vector<16x1024xf32>
    %c0_15 = arith.constant 0 : index
    %c0_16 = arith.constant 0 : index
    %c0_17 = arith.constant 0 : index
    %9 = vector.load %arg2[%c0_15, %c0_16, %c0_17] : memref<1x16x1024xf32, #tpu.memory_space<vmem>>, vector<1x16x1024xf32>
    %10 = vector.shape_cast %9 : vector<1x16x1024xf32> to vector<16x1024xf32>
    %cst = arith.constant dense<0.000000e+00> : vector<48x1024xf32>
    %11 = tpu.matmul %0, %8, %cst {dimension_numbers = #tpu.dot_dimension_numbers<[1], [0], [0], [1], [0, 0, 1, 1], [], []>} : vector<48x16xf32>, vector<16x1024xf32>, vector<48x1024xf32> -> vector<48x1024xf32>
    %cst_18 = arith.constant dense<0.000000e+00> : vector<48x1024xf32>
    %12 = tpu.matmul %1, %10, %cst_18 {dimension_numbers = #tpu.dot_dimension_numbers<[1], [0], [0], [1], [0, 0, 1, 1], [], []>} : vector<48x16xf32>, vector<16x1024xf32>, vector<48x1024xf32> -> vector<48x1024xf32>
    %13 = arith.addf %11, %12 : vector<48x1024xf32>
    %14 = vector.extract_strided_slice %13 {offsets = [0, 0], sizes = [32, 1024], strides = [1, 1]} : vector<48x1024xf32> to vector<32x1024xf32>
    %15 = vector.extract_strided_slice %13 {offsets = [32, 0], sizes = [16, 1024], strides = [1, 1]} : vector<48x1024xf32> to vector<16x1024xf32>
    %cst_19 = arith.constant dense<0.000000e+00> : vector<32xf32>
    %16 = vector.multi_reduction <add>, %14, %cst_19 [1] : vector<32x1024xf32> to vector<32xf32>
    %17 = vector.shape_cast %16 : vector<32xf32> to vector<32x1xf32>
    %18 = arith.mulf %14, %14 : vector<32x1024xf32>
    %cst_20 = arith.constant dense<0.000000e+00> : vector<32xf32>
    %19 = vector.multi_reduction <add>, %18, %cst_20 [1] : vector<32x1024xf32> to vector<32xf32>
    %20 = vector.shape_cast %19 : vector<32xf32> to vector<32x1xf32>
    %cst_21 = arith.constant 9.765625E-4 : f32
    %21 = vector.broadcast %cst_21 : f32 to vector<32x1xf32>
    %22 = arith.mulf %17, %21 : vector<32x1xf32>
    %cst_22 = arith.constant 9.765625E-4 : f32
    %23 = vector.broadcast %cst_22 : f32 to vector<32x1xf32>
    %24 = arith.mulf %20, %23 : vector<32x1xf32>
    %25 = arith.mulf %22, %22 : vector<32x1xf32>
    %26 = arith.subf %24, %25 : vector<32x1xf32>
    %cst_23 = arith.constant 0.000000e+00 : f32
    %27 = vector.broadcast %cst_23 : f32 to vector<32x1xf32>
    %28 = arith.maximumf %26, %27 : vector<32x1xf32>
    %cst_24 = arith.constant 9.99999974E-6 : f32
    %29 = vector.broadcast %cst_24 : f32 to vector<32x1xf32>
    %30 = arith.addf %28, %29 : vector<32x1xf32>
    %31 = math.rsqrt %30 : vector<32x1xf32>
    %32 = arith.mulf %3, %31 : vector<32x1xf32>
    %33 = arith.mulf %22, %32 : vector<32x1xf32>
    %34 = arith.subf %4, %33 : vector<32x1xf32>
    %35 = vector.broadcast %32 : vector<32x1xf32> to vector<32x1024xf32>
    %36 = arith.mulf %14, %35 : vector<32x1024xf32>
    %37 = vector.broadcast %34 : vector<32x1xf32> to vector<32x1024xf32>
    %38 = arith.addf %36, %37 : vector<32x1024xf32>
    %cst_25 = arith.constant 1.000000e-01 : f32
    %39 = vector.broadcast %cst_25 : f32 to vector<32x1024xf32>
    %40 = arith.mulf %39, %38 : vector<32x1024xf32>
    %41 = arith.maximumf %38, %40 : vector<32x1024xf32>
    %cst_26 = arith.constant dense<0.000000e+00> : vector<16x1024xf32>
    %42 = tpu.matmul %2, %41, %cst_26 {dimension_numbers = #tpu.dot_dimension_numbers<[1], [0], [0], [1], [0, 0, 1, 1], [], []>} : vector<16x32xf32>, vector<32x1024xf32>, vector<16x1024xf32> -> vector<16x1024xf32>
    %cst_27 = arith.constant dense<0.000000e+00> : vector<16xf32>
    %43 = vector.multi_reduction <add>, %42, %cst_27 [1] : vector<16x1024xf32> to vector<16xf32>
    %44 = vector.shape_cast %43 : vector<16xf32> to vector<16x1xf32>
    %45 = arith.mulf %42, %42 : vector<16x1024xf32>
    %cst_28 = arith.constant dense<0.000000e+00> : vector<16xf32>
    %46 = vector.multi_reduction <add>, %45, %cst_28 [1] : vector<16x1024xf32> to vector<16xf32>
    %47 = vector.shape_cast %46 : vector<16xf32> to vector<16x1xf32>
    %cst_29 = arith.constant 9.765625E-4 : f32
    %48 = vector.broadcast %cst_29 : f32 to vector<16x1xf32>
    %49 = arith.mulf %44, %48 : vector<16x1xf32>
    %cst_30 = arith.constant 9.765625E-4 : f32
    %50 = vector.broadcast %cst_30 : f32 to vector<16x1xf32>
    %51 = arith.mulf %47, %50 : vector<16x1xf32>
    %52 = arith.mulf %49, %49 : vector<16x1xf32>
    %53 = arith.subf %51, %52 : vector<16x1xf32>
    %cst_31 = arith.constant 0.000000e+00 : f32
    %54 = vector.broadcast %cst_31 : f32 to vector<16x1xf32>
    %55 = arith.maximumf %53, %54 : vector<16x1xf32>
    %cst_32 = arith.constant 9.99999974E-6 : f32
    %56 = vector.broadcast %cst_32 : f32 to vector<16x1xf32>
    %57 = arith.addf %55, %56 : vector<16x1xf32>
    %58 = math.rsqrt %57 : vector<16x1xf32>
    %59 = arith.mulf %5, %58 : vector<16x1xf32>
    %60 = arith.mulf %49, %59 : vector<16x1xf32>
    %61 = arith.subf %6, %60 : vector<16x1xf32>
    %62 = vector.broadcast %59 : vector<16x1xf32> to vector<16x1024xf32>
    %63 = arith.mulf %42, %62 : vector<16x1024xf32>
    %64 = vector.broadcast %61 : vector<16x1xf32> to vector<16x1024xf32>
    %65 = arith.addf %63, %64 : vector<16x1024xf32>
    %cst_33 = arith.constant 1.000000e-01 : f32
    %66 = vector.broadcast %cst_33 : f32 to vector<16x1024xf32>
    %67 = arith.mulf %66, %65 : vector<16x1024xf32>
    %68 = arith.maximumf %65, %67 : vector<16x1024xf32>
    %69 = arith.addf %15, %68 : vector<16x1024xf32>
    %c0_34 = arith.constant 0 : index
    %c0_35 = arith.constant 0 : index
    %c0_36 = arith.constant 0 : index
    %70 = vector.load %arg8[%c0_34, %c0_35, %c0_36] : memref<1x16x1024xf32, #tpu.memory_space<vmem>>, vector<1x16x1024xf32>
    %71 = vector.shape_cast %70 : vector<1x16x1024xf32> to vector<16x1024xf32>
    %72 = vector.shape_cast %69 : vector<16x1024xf32> to vector<1x16x1024xf32>
    tpu.vector_store %arg8[%c0_34, %c0_35, %c0_36], %72 {strides = array<i32>} : memref<1x16x1024xf32, #tpu.memory_space<vmem>>, vector<1x16x1024xf32>,
    return
  }
  func.func @transform_0(%arg0: i32) -> (i32, i32, i32) {
    %c0_i32 = arith.constant 0 : i32
    %c0_i32_0 = arith.constant 0 : i32
    %c0_i32_1 = arith.constant 0 : i32
    return %arg0, %c0_i32, %c0_i32_0 : i32, i32, i32
  }
  func.func @transform_1(%arg0: i32) -> (i32, i32, i32) {
    %c0_i32 = arith.constant 0 : i32
    %c0_i32_0 = arith.constant 0 : i32
    %c0_i32_1 = arith.constant 0 : i32
    return %arg0, %c0_i32, %c0_i32_0 : i32, i32, i32
  }
  func.func @transform_2(%arg0: i32) -> (i32, i32) {
    %c0_i32 = arith.constant 0 : i32
    %c0_i32_0 = arith.constant 0 : i32
    %c0_i32_1 = arith.constant 0 : i32
    return %c0_i32, %c0_i32_0 : i32, i32
  }
  func.func @transform_3(%arg0: i32) -> (i32, i32) {
    %c0_i32 = arith.constant 0 : i32
    %c0_i32_0 = arith.constant 0 : i32
    %c0_i32_1 = arith.constant 0 : i32
    return %c0_i32, %c0_i32_0 : i32, i32
  }
  func.func @transform_4(%arg0: i32) -> (i32, i32) {
    %c0_i32 = arith.constant 0 : i32
    %c0_i32_0 = arith.constant 0 : i32
    %c0_i32_1 = arith.constant 0 : i32
    return %c0_i32, %c0_i32_0 : i32, i32
  }
  func.func @transform_5(%arg0: i32) -> (i32, i32) {
    %c0_i32 = arith.constant 0 : i32
    %c0_i32_0 = arith.constant 0 : i32
    %c0_i32_1 = arith.constant 0 : i32
    return %c0_i32, %c0_i32_0 : i32, i32
  }
  func.func @transform_6(%arg0: i32) -> (i32, i32) {
    %c0_i32 = arith.constant 0 : i32
    %c0_i32_0 = arith.constant 0 : i32
    %c0_i32_1 = arith.constant 0 : i32
    return %c0_i32, %c0_i32_0 : i32, i32
  }
  func.func @transform_7(%arg0: i32) -> (i32, i32, i32) {
    %c0_i32 = arith.constant 0 : i32
    %c0_i32_0 = arith.constant 0 : i32
    %c0_i32_1 = arith.constant 0 : i32
    return %arg0, %c0_i32, %c0_i32_0 : i32, i32, i32
  }
}

</mosaic_0001>

<bundles_post_ra>
// kernel: tpu_custom_call.1
= control target key start
LH: loop header
LB: loop body
LE: loop exit
PB: predicated region body
PF: predicated region fallthrough
CT: control target
= control target key end

     0   :  { %s3553_s0 = inlined_call_operand.hbm [shape: f32[2,16,1024], index: 0, kind: input, shape index: {}]   ;;  %s3554_s1 = inlined_call_operand.hbm [shape: f32[2,16,1024], index: 1, kind: input, shape index: {}]   ;;  %s3555_s2 = inlined_call_operand.vmem [shape: f32[48,16], index: 2, kind: input, shape index: {}]   ;;  %s3556_s3 = inlined_call_operand.vmem [shape: f32[48,16], index: 3, kind: input, shape index: {}]   ;;  %s3557_s4 = inlined_call_operand.vmem [shape: f32[16,32], index: 4, kind: input, shape index: {}]   ;;  %s3558_s5 = inlined_call_operand.vmem [shape: f32[32,2], index: 5, kind: input, shape index: {}]   ;;  %s3559_s6 = inlined_call_operand.vmem [shape: f32[16,2], index: 6, kind: input, shape index: {}]   ;;  %s3560_s7 = inlined_call_operand.hbm [shape: f32[2,16,1024], index: 7, kind: output, shape index: {}]  }
   0x1   :  { %3569 = sst [smem:[#allocation25_spill]] %s3553_s0 }
   0x2   :  { %12 = vsyncpa [#allocation3], 0 }
   0x3   :  { %14 = vsyncpa [#allocation3 + $0x1], 0 }
   0x4   :  { %15 = vsyncpa [#allocation6], 0 }
   0x5   :  { %17 = vsyncpa [#allocation6 + $0x1], 0 }
   0x6   :  { %18 = vsyncpa [#allocation4], 0 }
   0x7   :  { %20 = vsyncpa [#allocation4 + $0x1], 0  ;;  %s2514_s24 = smov 0   ;;  %s2516_s25 = smov 0  }
   0x8   :  { %s2518_s26 = smov 0   ;;  %s2520_s27 = smov 0  }
   0x9 LB: > { %s2535_s28 = sadd.s32 4294967295, %s2461_s27   ;;  %s2183_s29 = sadd.s32 4294967294, %s2461_s27   ;;  %s2461_s27 = sphi %s2520_s27, %s3623_s27   ;;  %s2457_s26 = sphi %s2518_s26, %s3622_s26   ;;  %s2453_s25 = sphi %s2516_s25, %s3621_s25   ;;  %s2449_s24 = sphi %s2514_s24, %s3620_s24  }
   0xa   : > { %s2539_s30 = sadd.s32 1, %s2461_s27   ;;  %s33_s8 = sadd.s32 1, %s2457_s26 }
   0xb   : > { %s30_s9 = ssub.s32 %s2461_s27, %s2539_s30  ;;  %p40_p0 = scmp.ne.s32.totalorder %s2457_s26, %s2453_s25 }
   0xc   : > { %p31_p1 = scmp.eq.s32.totalorder %s30_s9, 0  ;;  %p41_p2 = scmp.eq.s32.totalorder %s2461_s27, 0 }
   0xd   : > { %p46_p3 = scmp.ne.s32.totalorder %s2453_s25, %s2449_s24  ;;  %p47_p4 = scmp.eq.s32.totalorder %s2535_s28, 0 }
   0xe   : > { %s2551_s10 = scalar_select %p31_p1, %s2457_s26, %s33_s8  }
   0xf   : > { %p2553_p5 = por %p41_p2, %p40_p0  ;;  %p2557_p6 = por %p47_p4, %p46_p3 }
  0x10   : > { %3570 = sst [smem:[#allocation11_spill]] %s2551_s10  ;;  %p201_p7 = scmp.eq.s32.totalorder %s2535_s28, 1 }
  0x11   : > { %s3572_s12 = scalar_select %p2557_p6, 1, 0 }
  0x12   : > { %p207_p8 = scmp.eq.s32.totalorder %s2183_s29, 1  ;;  %p2277_p10 = scmp.lt.s32.totalorder %s2461_s27, 2 }
  0x13   : > { %p2564_p11 = por %p201_p7, %p40_p0  ;;  %s2573_s15 = sand.u32 1, %s2457_s26  }
  0x14   : > { %p2568_p12 = por %p207_p8, %p46_p3  ;;  %s3562_s16 = sshll.u32 %s2461_s27, 11 }
  0x15   : > { %s3573_s13 = scalar_select %p2564_p11, 1, 0 }
  0x16   : > { %s3574_s14 = scalar_select %p2568_p12, 1, 0 }
  0x17   : > { %s3561_s17 = sshll.u32 %s2573_s15, 7  ;;  %s3575_s0 = sld [smem:[#allocation25_spill]] }
  0x18   : > { %s246_s21 = scalar_lea.vmem [#allocation2], %s3561_s17  ;;  %p2588_p13 = pnand %p2277_p10, %p2553_p5 }
  0x19   : > { %s253_s22 = sshll.u32 %s246_s21, 4  ;;  %s243_s29 = scalar_lea.sflag [#allocation3], %s2573_s15  ;;  %s2592_s22 = int_to_ptr.vmem [resolvable:$true] %s253_s22 }
  0x1a   : > { %p2339_p1 = pneg %p2588_p13 }
  0x1d   : > { %s2582_s20 = scalar_lea.hbm %s3575_s0, %s3562_s16  ;;  %s2342_s11 = scalar_lea.hbm %s3575_s0, 4096 }
  0x1e   : > { %s2337_s8 = scalar_lea.hbm %s2582_s20, 2048  ;;  %p2343_p4 = scmp.lt.s32.totalorder %s2582_s20, %s3575_s0 }
  0x1f   : > { %p2338_p0 = scmp.ne.s32.totalorder %s2582_s20, %s2337_s8  ;;  %p2344_p5 = scmp.lt.s32.totalorder %s2342_s11, %s2337_s8 }
  0x21   : > { %p2340_p2 = pnand %p2339_p1, %p2338_p0  ;;  %p2345_p7 = por %p2344_p5, %p2343_p4 }
  0x23   : > { %p2341_p3 = pneg %p2340_p2 }
  0x25   : > { %p2346_p8 = pnand %p2345_p7, %p2341_p3 }
  0x27   : > { %2349 = shalt.err (!%p2346_p8)
}
  0x28   : > { %s2350_s17 = scalar_lea.vmem %s2592_s22, 2048  ;;  %s2463_s9 = smov [#allocation2]  }
  0x29   : > { %p2351_p10 = scmp.ne.s32.totalorder %s2592_s22, %s2350_s17  ;;  %s2355_s18 = sshll.u32 %s2463_s9, 4  ;;  %s2356_s18 = int_to_ptr.vmem [resolvable:$false] %s2355_s18 }
  0x2a   : > { %s2357_s16 = scalar_lea.vmem %s2356_s18, 4096  ;;  %p2358_p9 = scmp.lt.s32.totalorder %s2592_s22, %s2356_s18 }
  0x2b   : > { %p2353_p0 = pnand %p2351_p10, %p2339_p1  ;;  %p2359_p12 = scmp.lt.s32.totalorder %s2357_s16, %s2350_s17 }
  0x2d   : > { %p2354_p2 = pneg %p2353_p0  ;;  %p2360_p11 = por %p2359_p12, %p2358_p9 }
  0x2f   : > { %p2361_p4 = pnand %p2360_p11, %p2354_p2 }
  0x31   : > { %2364 = shalt.err (!%p2361_p4)
}
  0x32   : > { %s3564_s8 = smov 1024   ;;  %s2465_s11 = smov 64  }
  0x33   : > { %2269 = dma.hbm_to_vmem [thread:$0]  (!%p2588_p13), %s2582_s20, 2048, %s2592_s22, %s243_s29, %s3564_s8, %s3564_s8, %s2465_s11  }
  0x34   : > { %p2192_p9 = scmp.ge.s32.totalorder %s2461_s27, 1  ;;  %p282_p11 = scmp.lt.s32.totalorder %s2461_s27, 3 }
  0x35   : > { %s3578_s17 = sshll.u32 %s2461_s27, 11  ;;  %s3579_s18 = sshll.u32 %s2573_s15, 7 }
  0x36   : > { %p2626_p12 = pnand %p2192_p9, %p282_p11  ;;  %s2635_s9 = scalar_lea.hbm %s3554_s1, %s3578_s17 }
  0x37   : > { %s267_s0 = scalar_lea.vmem [#allocation5], %s3579_s18  ;;  %s264_s20 = scalar_lea.sflag [#allocation6], %s2573_s15 }
  0x38   : > { %s274_s10 = sshll.u32 %s267_s0, 4  ;;  %s2365_s22 = scalar_lea.hbm %s2635_s9, 2048  ;;  %s2639_s10 = int_to_ptr.vmem [resolvable:$true] %s274_s10 }
  0x39   : > { %p2366_p3 = scmp.ne.s32.totalorder %s2635_s9, %s2365_s22  ;;  %s2370_s17 = scalar_lea.hbm %s3554_s1, 4096 }
  0x3a   : > { %p2371_p8 = scmp.lt.s32.totalorder %s2635_s9, %s3554_s1  ;;  %p2372_p10 = scmp.lt.s32.totalorder %s2370_s17, %s2365_s22 }
  0x3b   : > { %p2368_p5 = pnand %p2366_p3, %p2339_p1 }
  0x3c   : > { %p2373_p0 = por %p2372_p10, %p2371_p8 }
  0x3d   : > { %p2369_p7 = pneg %p2368_p5 }
  0x3f   : > { %p2374_p2 = pnand %p2373_p0, %p2369_p7 }
  0x41   : > { %2377 = shalt.err (!%p2374_p2)
}
  0x42   : > { %s2378_s0 = scalar_lea.vmem %s2639_s10, 2048  ;;  %s2466_s15 = smov [#allocation5]  }
  0x43   : > { %p2379_p4 = scmp.ne.s32.totalorder %s2639_s10, %s2378_s0  ;;  %s2383_s8 = sshll.u32 %s2466_s15, 4  ;;  %s2384_s8 = int_to_ptr.vmem [resolvable:$false] %s2383_s8 }
  0x44   : > { %s2385_s18 = scalar_lea.vmem %s2384_s8, 4096  ;;  %p2386_p3 = scmp.lt.s32.totalorder %s2639_s10, %s2384_s8 }
  0x45   : > { %p2381_p9 = pnand %p2379_p4, %p2339_p1  ;;  %p2387_p5 = scmp.lt.s32.totalorder %s2385_s18, %s2378_s0 }
  0x47   : > { %p2382_p11 = pneg %p2381_p9  ;;  %p2388_p6 = por %p2387_p5, %p2386_p3 }
  0x49   : > { %p2389_p8 = pnand %p2388_p6, %p2382_p11 }
  0x4b   : > { %2392 = shalt.err (!%p2389_p8)
}
  0x4c   : > { %s3580_s22 = smov 1024   ;;  %286 = sbr.rel (%p2626_p12) target bundleno = 1465 (0x5b9), region = 48 }
  0x4d   : > { %2272 = dma.hbm_to_vmem [thread:$0]  (!%p2588_p13), %s2635_s9, 2048, %s2639_s10, %s264_s20, %s3580_s22, %s3580_s22, %s2465_s11  }
  0x51   : > { %s2670_s29 = sand.u32 1, %s2453_s25   ;;  %p3581_p6 = scmp.ne.s32.totalorder %s3572_s12, 0 }
  0x52   : > { %s2673_s17 = sshll.u32 %s2670_s29, 7  ;;  %s289_s19 = scalar_lea.sflag [#allocation3], %s2670_s29 }
  0x53   : > { %s2677_s23 = scalar_lea.vmem [#allocation2], %s2673_s17 }
  0x54   : > { %2436 = dma.done.wait (%p3581_p6), %s289_s19, 2048  }
  0x55   : > { %2438 = vsyncadd (%p3581_p6), %s289_s19, 4294965248  ;;  %s298_s10 = scalar_lea.sflag [#allocation6], %s2670_s29  ;;  %s2685_s11 = scalar_lea.vmem [#allocation5], %s2673_s17 }
  0x56   : > { %2440 = dma.done.wait (%p3581_p6), %s298_s10, 2048  }
  0x57   : > { %2442 = vsyncadd (%p3581_p6), %s298_s10, 4294965248  ;;  %v3566_v0 = vmov 0.0   ;;  %v382_v1 = vld [vmem:[%s2685_s11 + $0x48] sm:$0xff]  ;;  %v384_v2 = vld [vmem:[%s2685_s11 + $0x58] sm:$0xff]  ;;  %vm389_vm0 = vcmask 130048   ;;  %s2469_s20 = smov 1  }
  0x58   : > { %472 = vmatprep.mubr.f32.mxu0 %v3566_v0  ;;  %573 = vmatprep.mubr.f32.mxu1 %v3566_v0  ;;  %v381_v3 = vld [vmem:[%s2685_s11 + $0x40] sm:$0xff]  ;;  %v383_v4 = vld [vmem:[%s2685_s11 + $0x50] sm:$0xff]  ;;  %v374_v5 = vld [vmem:[%s2685_s11 + $0x8] sm:$0xff]  ;;  %vm1562_vm1 = vcmask 261120   ;;  %s3477_s12 = scalar_lea.vmem [#allocation7], %s2673_s17  ;;  %s2259_s17 = sshll.u32 %s2535_s28, 11 }
  0x59   : > { %436 = vmatprep.subr.mxu0 %v382_v1  ;;  %537 = vmatprep.subr.mxu1 %v384_v2  ;;  %v376_v6 = vld [vmem:[%s2685_s11 + $0x18] sm:$0xff]  ;;  %v373_v7 = vld [vmem:[%s2685_s11] sm:$0xff]  ;;  %v375_v8 = vld [vmem:[%s2685_s11 + $0x10] sm:$0xff]  ;;  %s2087_s16 = sshll.u32 %s3477_s12, 4  ;;  %s2074_s21 = scalar_lea.sflag [#allocation4], %s2670_s29  ;;  %s3500_s16 = int_to_ptr.vmem [resolvable:$true] %s2087_s16 }
  0x5a   : > { %437 = vmatpush1.msra.mxu0 %v381_v3  ;;  %538 = vmatpush1.msra.mxu1 %v383_v4  ;;  %v343_v9 = vld [vmem:[%s3556_s3] sm:$0xff]  ;;  %v386_v10 = vld [vmem:[%s2685_s11 + $0x68] sm:$0xff]  ;;  %v388_v12 = vld [vmem:[%s2685_s11 + $0x78] sm:$0xff]  ;;  %p3616_p1 = scmp.ne.s32.totalorder %s3573_s13, 0  ;;  %s2471_s0 = smov [#allocation7]  }
  0x5b   : > { %438 = vmatprep.subr.mxu0 %v374_v5  ;;  %539 = vmatprep.subr.mxu1 %v376_v6  ;;  %v385_v11 = vld [vmem:[%s2685_s11 + $0x60] sm:$0xff]  ;;  %v387_v13 = vld [vmem:[%s2685_s11 + $0x70] sm:$0xff]  ;;  %v344_v14 = vld [vmem:[%s3556_s3 + $0x8] sm:$0xff]  ;;  %s2397_s15 = sshll.u32 %s2471_s0, 4  ;;  %s2398_s15 = int_to_ptr.vmem [resolvable:$false] %s2397_s15 }
  0x5c   : > { %439 = vmatpush1.msra.mxu0 %v373_v7  ;;  %540 = vmatpush1.msra.mxu1 %v375_v8  ;;  %v378_v15 = vld [vmem:[%s2685_s11 + $0x28] sm:$0xff]  ;;  %v380_v16 = vld [vmem:[%s2685_s11 + $0x38] sm:$0xff]  ;;  %v377_v17 = vld [vmem:[%s2685_s11 + $0x20] sm:$0xff]  ;;  %s2399_s8 = scalar_lea.vmem %s2398_s15, 4096  ;;  %p2400_p10 = scmp.lt.s32.totalorder %s3500_s16, %s2398_s15 }
  0x5d   : > { %2196 = vmatmul.mubr.msk.f32.vlgmr.msra.gmra.mxu0 %vm389_vm0, %v343_v9  ;;  %2202 = vmatmul.mubr.msk.f32.vlgmr.msra.gmra.mxu1 %vm389_vm0, %v343_v9  ;;  %v379_v18 = vld [vmem:[%s2685_s11 + $0x30] sm:$0xff]  ;;  %v366_v20 = vld [vmem:[%s2677_s23 + $0x48] sm:$0xff]  ;;  %v368_v21 = vld [vmem:[%s2677_s23 + $0x58] sm:$0xff] }
  0x5e   : > { %478 = vmatprep.mubr.f32.mxu0 %v3566_v0  ;;  %579 = vmatprep.mubr.f32.mxu1 %v3566_v0  ;;  %v345_v19 = vld [vmem:[%s3556_s3 + $0x10] sm:$0xff]  ;;  %v346_v22 = vld [vmem:[%s3556_s3 + $0x18] sm:$0xff]  ;;  %v347_v23 = vld [vmem:[%s3556_s3 + $0x20] sm:$0xff] }
  0x5f   : > { %638 = vmatprep.subr.mxu0 %v386_v10  ;;  %739 = vmatprep.subr.mxu1 %v388_v12  ;;  %v348_v24 = vld [vmem:[%s3556_s3 + $0x28] sm:$0xff]  ;;  %v365_v25 = vld [vmem:[%s2677_s23 + $0x40] sm:$0xff]  ;;  %v367_v26 = vld [vmem:[%s2677_s23 + $0x50] sm:$0xff] }
  0x60   : > { %639 = vmatpush1.msra.mxu0 %v385_v11  ;;  %740 = vmatpush1.msra.mxu1 %v387_v13  ;;  %v358_v27 = vld [vmem:[%s2677_s23 + $0x8] sm:$0xff]  ;;  %v360_v28 = vld [vmem:[%s2677_s23 + $0x18] sm:$0xff]  ;;  %v357_v29 = vld [vmem:[%s2677_s23] sm:$0xff] }
  0x61   : > { %2197 = vmatmul.mubr.msk.f32.gmra.mxu0 %vm389_vm0, %v344_v14  ;;  %2203 = vmatmul.mubr.msk.f32.gmra.mxu1 %vm389_vm0, %v344_v14  ;;  %v359_v30 = vld [vmem:[%s2677_s23 + $0x10] sm:$0xff]  ;;  %v370_v31 = vld [vmem:[%s2677_s23 + $0x68] sm:$0xff]  ;;  %v372_v32 = vld [vmem:[%s2677_s23 + $0x78] sm:$0xff] }
  0x62   : > { %484 = vmatprep.mubr.f32.mxu0 %v3566_v0  ;;  %585 = vmatprep.mubr.f32.mxu1 %v3566_v0  ;;  %v337_v33 = vld [vmem:[%s3555_s2] sm:$0xff]  ;;  %v371_v35 = vld [vmem:[%s2677_s23 + $0x70] sm:$0xff]  ;;  %v362_v36 = vld [vmem:[%s2677_s23 + $0x28] sm:$0xff] }
  0x63   : > { %640 = vmatprep.subr.mxu0 %v378_v15  ;;  %741 = vmatprep.subr.mxu1 %v380_v16  ;;  %v369_v34 = vld [vmem:[%s2677_s23 + $0x60] sm:$0xff]  ;;  %v364_v37 = vld [vmem:[%s2677_s23 + $0x38] sm:$0xff]  ;;  %v338_v38 = vld [vmem:[%s3555_s2 + $0x8] sm:$0xff] }
  0x64   : > { %641 = vmatpush1.msra.mxu0 %v377_v17  ;;  %742 = vmatpush1.msra.mxu1 %v379_v18  ;;  %v361_v39 = vld [vmem:[%s2677_s23 + $0x20] sm:$0xff]  ;;  %v363_v40 = vld [vmem:[%s2677_s23 + $0x30] sm:$0xff]  ;;  %v340_v42 = vld [vmem:[%s3555_s2 + $0x18] sm:$0xff]  ;;  %s2393_s23 = scalar_lea.vmem %s3500_s16, 2048 }
  0x65   : > { %2198 = vmatmul.mubr.msk.f32.gmra.mxu0 %vm389_vm0, %v345_v19  ;;  %2204 = vmatmul.mubr.msk.f32.gmra.mxu1 %vm389_vm0, %v345_v19  ;;  %v339_v41 = vld [vmem:[%s3555_s2 + $0x10] sm:$0xff]  ;;  %v341_v43 = vld [vmem:[%s3555_s2 + $0x20] sm:$0xff]  ;;  %v342_v44 = vld [vmem:[%s3555_s2 + $0x28] sm:$0xff]  ;;  %p2394_p13 = scmp.ne.s32.totalorder %s3500_s16, %s2393_s23  ;;  %p2401_p0 = scmp.lt.s32.totalorder %s2399_s8, %s2393_s23 }
  0x66   : > { %490 = vmatprep.mubr.f32.mxu0 %v3566_v0  ;;  %591 = vmatprep.mubr.f32.mxu1 %v3566_v0 }
  0x67   : > { %858 = vmatprep.subr.mxu0 %v366_v20  ;;  %959 = vmatprep.subr.mxu1 %v368_v21  ;;  %p2395_p12 = pnand %p2394_p13, %p3616_p1  ;;  %p2402_p2 = por %p2401_p0, %p2400_p10 }
  0x69   : > { %2199 = vmatmul.mubr.msk.f32.gmra.mxu0 %vm389_vm0, %v346_v22  ;;  %2205 = vmatmul.mubr.msk.f32.gmra.mxu1 %vm389_vm0, %v346_v22  ;;  %p2396_p7 = pneg %p2395_p12 }
  0x6a   : > { %496 = vmatprep.mubr.f32.mxu0 %v3566_v0  ;;  %597 = vmatprep.mubr.f32.mxu1 %v3566_v0 }
  0x6b   : > { %p2403_p4 = pnand %p2402_p2, %p2396_p7 }
  0x6d   : > { %2200 = vmatmul.mubr.msk.f32.gmra.mxu0 %vm389_vm0, %v347_v23  ;;  %2206 = vmatmul.mubr.msk.f32.gmra.mxu1 %vm389_vm0, %v347_v23 }
  0x6e   : > { %502 = vmatprep.mubr.f32.mxu0 %v3566_v0  ;;  %603 = vmatprep.mubr.f32.mxu1 %v3566_v0 }
  0x71   : > { %2201 = vmatmul.mubr.msk.f32.gmra.mxu0 %vm389_vm0, %v348_v24  ;;  %2207 = vmatmul.mubr.msk.f32.gmra.mxu1 %vm389_vm0, %v348_v24 }
  0x72   : > { %674 = vmatprep.mubr.f32.mxu0 %v3566_v0  ;;  %775 = vmatprep.mubr.f32.mxu1 %v3566_v0 }
  0x75   : > { %2208 = vmatmul.mubr.msk.f32.vlgmr.msra.gmra.mxu0 %vm389_vm0, %v343_v9  ;;  %2214 = vmatmul.mubr.msk.f32.vlgmr.msra.gmra.mxu1 %vm389_vm0, %v343_v9 }
  0x76   : > { %680 = vmatprep.mubr.f32.mxu0 %v3566_v0  ;;  %781 = vmatprep.mubr.f32.mxu1 %v3566_v0 }
  0x77   : > { %859 = vmatpush1.msra.mxu0 %v365_v25  ;;  %960 = vmatpush1.msra.mxu1 %v367_v26 }
  0x78   : > { %860 = vmatprep.subr.mxu0 %v358_v27  ;;  %961 = vmatprep.subr.mxu1 %v360_v28 }
  0x79   : > { %2209 = vmatmul.mubr.msk.f32.gmra.mxu0 %vm389_vm0, %v344_v14  ;;  %2215 = vmatmul.mubr.msk.f32.gmra.mxu1 %vm389_vm0, %v344_v14 }
  0x7a   : > { %686 = vmatprep.mubr.f32.mxu0 %v3566_v0  ;;  %787 = vmatprep.mubr.f32.mxu1 %v3566_v0 }
  0x7b   : > { %861 = vmatpush1.msra.mxu0 %v357_v29  ;;  %962 = vmatpush1.msra.mxu1 %v359_v30 }
  0x7c   : > { %1060 = vmatprep.subr.mxu0 %v370_v31  ;;  %1161 = vmatprep.subr.mxu1 %v372_v32 }
  0x7d   : > { %2210 = vmatmul.mubr.msk.f32.gmra.mxu0 %vm389_vm0, %v345_v19  ;;  %2216 = vmatmul.mubr.msk.f32.gmra.mxu1 %vm389_vm0, %v345_v19 }
  0x7e   : > { %692 = vmatprep.mubr.f32.mxu0 %v3566_v0  ;;  %793 = vmatprep.mubr.f32.mxu1 %v3566_v0 }
  0x81   : > { %2211 = vmatmul.mubr.msk.f32.gmra.mxu0 %vm389_vm0, %v346_v22  ;;  %2217 = vmatmul.mubr.msk.f32.gmra.mxu1 %vm389_vm0, %v346_v22 }
  0x82   : > { %698 = vmatprep.mubr.f32.mxu0 %v3566_v0  ;;  %799 = vmatprep.mubr.f32.mxu1 %v3566_v0 }
  0x85   : > { %2212 = vmatmul.mubr.msk.f32.gmra.mxu0 %vm389_vm0, %v347_v23  ;;  %2218 = vmatmul.mubr.msk.f32.gmra.mxu1 %vm389_vm0, %v347_v23 }
  0x86   : > { %704 = vmatprep.mubr.f32.mxu0 %v3566_v0  ;;  %805 = vmatprep.mubr.f32.mxu1 %v3566_v0 }
  0x89   : > { %2213 = vmatmul.mubr.msk.f32.gmra.mxu0 %vm389_vm0, %v348_v24  ;;  %2219 = vmatmul.mubr.msk.f32.gmra.mxu1 %vm389_vm0, %v348_v24 }
  0x8a   : > { %894 = vmatprep.mubr.f32.mxu0 %v3566_v0  ;;  %995 = vmatprep.mubr.f32.mxu1 %v3566_v0 }
  0x8d   : > { %2220 = vmatmul.mubr.msk.f32.vlgmr.msra.gmra.mxu0 %vm389_vm0, %v337_v33  ;;  %2226 = vmatmul.mubr.msk.f32.vlgmr.msra.gmra.mxu1 %vm389_vm0, %v337_v33 }
  0x8e   : > { %900 = vmatprep.mubr.f32.mxu0 %v3566_v0  ;;  %1001 = vmatprep.mubr.f32.mxu1 %v3566_v0 }
  0x8f   : > { %1061 = vmatpush1.msra.mxu0 %v369_v34  ;;  %1162 = vmatpush1.msra.mxu1 %v371_v35 }
  0x90   : > { %1062 = vmatprep.subr.mxu0 %v362_v36  ;;  %1163 = vmatprep.subr.mxu1 %v364_v37 }
  0x91   : > { %2221 = vmatmul.mubr.msk.f32.gmra.mxu0 %vm389_vm0, %v338_v38  ;;  %2227 = vmatmul.mubr.msk.f32.gmra.mxu1 %vm389_vm0, %v338_v38 }
  0x92   : > { %906 = vmatprep.mubr.f32.mxu0 %v3566_v0  ;;  %1007 = vmatprep.mubr.f32.mxu1 %v3566_v0 }
  0x93   : > { %1063 = vmatpush1.msra.mxu0 %v361_v39  ;;  %1164 = vmatpush1.msra.mxu1 %v363_v40 }
  0x95   : > { %2222 = vmatmul.mubr.msk.f32.gmra.mxu0 %vm389_vm0, %v339_v41  ;;  %2228 = vmatmul.mubr.msk.f32.gmra.mxu1 %vm389_vm0, %v339_v41 }
  0x96   : > { %912 = vmatprep.mubr.f32.mxu0 %v3566_v0  ;;  %1013 = vmatprep.mubr.f32.mxu1 %v3566_v0 }
  0x99   : > { %2223 = vmatmul.mubr.msk.f32.gmra.mxu0 %vm389_vm0, %v340_v42  ;;  %2229 = vmatmul.mubr.msk.f32.gmra.mxu1 %vm389_vm0, %v340_v42 }
  0x9a   : > { %918 = vmatprep.mubr.f32.mxu0 %v3566_v0  ;;  %1019 = vmatprep.mubr.f32.mxu1 %v3566_v0 }
  0x9d   : > { %2224 = vmatmul.mubr.msk.f32.gmra.mxu0 %vm389_vm0, %v341_v43  ;;  %2230 = vmatmul.mubr.msk.f32.gmra.mxu1 %vm389_vm0, %v341_v43 }
  0x9e   : > { %924 = vmatprep.mubr.f32.mxu0 %v3566_v0  ;;  %1025 = vmatprep.mubr.f32.mxu1 %v3566_v0 }
  0xa1   : > { %2225 = vmatmul.mubr.msk.f32.gmra.mxu0 %vm389_vm0, %v342_v44  ;;  %2231 = vmatmul.mubr.msk.f32.gmra.mxu1 %vm389_vm0, %v342_v44 }
  0xa2   : > { %1096 = vmatprep.mubr.f32.mxu0 %v3566_v0  ;;  %1197 = vmatprep.mubr.f32.mxu1 %v3566_v0 }
  0xa5   : > { %2232 = vmatmul.mubr.msk.f32.vlgmr.msra.gmra.mxu0 %vm389_vm0, %v337_v33  ;;  %2238 = vmatmul.mubr.msk.f32.vlgmr.msra.gmra.mxu1 %vm389_vm0, %v337_v33 }
  0xa6   : > { %1102 = vmatprep.mubr.f32.mxu0 %v3566_v0  ;;  %1203 = vmatprep.mubr.f32.mxu1 %v3566_v0 }
  0xa9   : > { %2233 = vmatmul.mubr.msk.f32.gmra.mxu0 %vm389_vm0, %v338_v38  ;;  %2239 = vmatmul.mubr.msk.f32.gmra.mxu1 %vm389_vm0, %v338_v38 }
  0xaa   : > { %1108 = vmatprep.mubr.f32.mxu0 %v3566_v0  ;;  %1209 = vmatprep.mubr.f32.mxu1 %v3566_v0 }
  0xad   : > { %2234 = vmatmul.mubr.msk.f32.gmra.mxu0 %vm389_vm0, %v339_v41  ;;  %2240 = vmatmul.mubr.msk.f32.gmra.mxu1 %vm389_vm0, %v339_v41 }
  0xae   : > { %1114 = vmatprep.mubr.f32.mxu0 %v3566_v0  ;;  %1215 = vmatprep.mubr.f32.mxu1 %v3566_v0 }
  0xb1   : > { %2235 = vmatmul.mubr.msk.f32.gmra.mxu0 %vm389_vm0, %v340_v42  ;;  %2241 = vmatmul.mubr.msk.f32.gmra.mxu1 %vm389_vm0, %v340_v42 }
  0xb2   : > { %1120 = vmatprep.mubr.f32.mxu0 %v3566_v0  ;;  %1221 = vmatprep.mubr.f32.mxu1 %v3566_v0 }
  0xb5   : > { %2236 = vmatmul.mubr.msk.f32.gmra.mxu0 %vm389_vm0, %v341_v43  ;;  %2242 = vmatmul.mubr.msk.f32.gmra.mxu1 %vm389_vm0, %v341_v43 }
  0xb6   : > { %1126 = vmatprep.mubr.f32.mxu0 %v3566_v0  ;;  %1227 = vmatprep.mubr.f32.mxu1 %v3566_v0 }
  0xb9   : > { %2237 = vmatmul.mubr.msk.f32.gmra.mxu0 %vm389_vm0, %v342_v44  ;;  %2243 = vmatmul.mubr.msk.f32.gmra.mxu1 %vm389_vm0, %v342_v44 }
  0xba   : > { %1633 = vmatprep.mubr.f32.mxu0 %v3566_v0  ;;  %1710 = vmatprep.mubr.f32.mxu1 %v3566_v0 }
 0x11d   : > { %v2857_v45 = vpop.f32.mrf.mxu0  ;;  %v2859_v46 = vpop.f32.mrf.mxu1 }
 0x11f   : > { %v476_v47 = vpop.f32.mrf.mxu0  ;;  %v2861_v48 = vpop.f32.mrf.mxu1 }
 0x121   : > { %v2863_v49 = vpop.f32.mrf.mxu0  ;;  %v2865_v50 = vpop.f32.mrf.mxu1 }
 0x123   : > { %v482_v51 = vpop.f32.mrf.mxu0  ;;  %v2867_v52 = vpop.f32.mrf.mxu1 }
 0x125   : > { %v2869_v53 = vpop.f32.mrf.mxu0  ;;  %v2871_v54 = vpop.f32.mrf.mxu1 }
 0x127   : > { %v488_v55 = vpop.f32.mrf.mxu0  ;;  %v2873_v56 = vpop.f32.mrf.mxu1 }
 0x129   : > { %v2875_v57 = vpop.f32.mrf.mxu0  ;;  %v2877_v58 = vpop.f32.mrf.mxu1 }
 0x12b   : > { %v494_v59 = vpop.f32.mrf.mxu0  ;;  %v2879_v60 = vpop.f32.mrf.mxu1 }
 0x12d   : > { %v498_v61 = vpop.f32.mrf.mxu0  ;;  %v599_v62 = vpop.f32.mrf.mxu1 }
 0x12f   : > { %v2881_v63 = vpop.f32.mrf.mxu0  ;;  %v2883_v1 = vpop.f32.mrf.mxu1 }
 0x131   : > { %v2885_v2 = vpop.f32.mrf.mxu0  ;;  %v2887_v3 = vpop.f32.mrf.mxu1 }
 0x133   : > { %v2889_v4 = vpop.f32.mrf.mxu0  ;;  %v2891_v5 = vpop.f32.mrf.mxu1 }
 0x135   : > { %v2893_v6 = vpop.f32.mrf.mxu0  ;;  %v2895_v7 = vpop.f32.mrf.mxu1 }
 0x136   : > { %3582 = vst [vmem:[#allocation12_spill] sm:$0xff] %v2895_v7 }
 0x137   : > { %v2897_v8 = vpop.f32.mrf.mxu0  ;;  %v2899_v9 = vpop.f32.mrf.mxu1 }
 0x138   : > { %3583 = vst [vmem:[#allocation13_spill] sm:$0xff] %v2899_v9 }
 0x139   : > { %v2901_v10 = vpop.f32.mrf.mxu0  ;;  %v2903_v11 = vpop.f32.mrf.mxu1 }
 0x13b   : > { %v2905_v12 = vpop.f32.mrf.mxu0  ;;  %v2907_v13 = vpop.f32.mrf.mxu1 }
 0x13d   : > { %v2909_v14 = vpop.f32.mrf.mxu0  ;;  %v2911_v15 = vpop.f32.mrf.mxu1 }
 0x13f   : > { %v2913_v16 = vpop.f32.mrf.mxu0  ;;  %v2915_v17 = vpop.f32.mrf.mxu1 }
 0x141   : > { %v2917_v18 = vpop.f32.mrf.mxu0  ;;  %v2919_v19 = vpop.f32.mrf.mxu1 }
 0x143   : > { %v2921_v20 = vpop.f32.mrf.mxu0  ;;  %v2923_v21 = vpop.f32.mrf.mxu1 }
 0x145   : > { %v2925_v22 = vpop.f32.mrf.mxu0  ;;  %v2927_v23 = vpop.f32.mrf.mxu1 }
 0x146   : > { %3584 = vst [vmem:[#allocation14_spill] sm:$0xff] %v2927_v23 }
 0x147   : > { %v2929_v24 = vpop.f32.mrf.mxu0  ;;  %v2931_v25 = vpop.f32.mrf.mxu1 }
 0x148   : > { %3585 = vst [vmem:[#allocation15_spill] sm:$0xff] %v2929_v24  ;;  %3586 = vst [vmem:[#allocation16_spill] sm:$0xff] %v2931_v25 }
 0x149   : > { %v2933_v26 = vpop.f32.mrf.mxu0  ;;  %v2935_v27 = vpop.f32.mrf.mxu1 }
 0x14a   : > { %3587 = vst [vmem:[#allocation17_spill] sm:$0xff] %v2933_v26  ;;  %3588 = vst [vmem:[#allocation18_spill] sm:$0xff] %v2935_v27 }
 0x14b   : > { %v2937_v28 = vpop.f32.mrf.mxu0  ;;  %v2939_v29 = vpop.f32.mrf.mxu1 }
 0x14c   : > { %3589 = vst [vmem:[#allocation19_spill] sm:$0xff] %v2937_v28  ;;  %3590 = vst [vmem:[#allocation20_spill] sm:$0xff] %v2939_v29 }
 0x14d   : > { %v896_v30 = vpop.f32.mrf.mxu0  ;;  %v997_v31 = vpop.f32.mrf.mxu1 }
 0x14e   : > { %v2944_v29 = vadd.f32 %v896_v30, %v2857_v45  ;;  %v2949_v7 = vadd.f32 %v997_v31, %v2859_v46 }
 0x14f   : > { %v898_v32 = vpop.f32.mrf.mxu0  ;;  %v999_v33 = vpop.f32.mrf.mxu1 }
 0x150   : > { %v2941_v44 = vadd.f32 %v898_v32, %v476_v47  ;;  %v1270_v46 = vmul.f32 %v2944_v29, %v2944_v29  ;;  %v2967_v31 = vadd.f32 %v999_v33, %v2861_v48 }
 0x151   : > { %v902_v34 = vpop.f32.mrf.mxu0  ;;  %v1003_v35 = vpop.f32.mrf.mxu1 }
 0x152   : > { %v1271_v25 = vmul.f32 %v2941_v44, %v2941_v44  ;;  %v2956_v47 = vadd.f32 %v902_v34, %v2863_v49 }
 0x153   : > { %v904_v36 = vpop.f32.mrf.mxu0  ;;  %v1005_v37 = vpop.f32.mrf.mxu1 }
 0x154   : > { %v2946_v9 = vadd.f32 %v904_v36, %v482_v51  ;;  %v1302_v34 = vadd.f32 %v1271_v25, %v1270_v46 }
 0x155   : > { %v908_v38 = vpop.f32.mrf.mxu0  ;;  %v1009_v39 = vpop.f32.mrf.mxu1 }
 0x157   : > { %v910_v40 = vpop.f32.mrf.mxu0  ;;  %v1011_v41 = vpop.f32.mrf.mxu1 }
 0x158   : > { %v2953_v24 = vadd.f32 %v910_v40, %v488_v55  ;;  %v2970_v55 = vadd.f32 %v908_v38, %v2869_v53  ;;  %v1279_v53 = vmul.f32 %v2946_v9, %v2946_v9 }
 0x159   : > { %v914_v42 = vpop.f32.mrf.mxu0  ;;  %v1015_v43 = vpop.f32.mrf.mxu1 }
 0x15b   : > { %v916_v0 = vpop.f32.mrf.mxu0  ;;  %v1017_v28 = vpop.f32.mrf.mxu1 }
 0x15c   : > { %v2958_v32 = vadd.f32 %v916_v0, %v494_v59  ;;  %v1234_v0 = vadd.f32 %v2941_v44, %v2944_v29  ;;  %v1243_v59 = vadd.f32 %v2946_v9, %v2956_v47 }
 0x15d   : > { %v920_v27 = vpop.f32.mrf.mxu0  ;;  %v1021_v26 = vpop.f32.mrf.mxu1 }
 0x15e   : > { %v2960_v23 = vadd.f32 %v920_v27, %v498_v61  ;;  %v2962_v45 = vadd.f32 %v1021_v26, %v599_v62  ;;  %v2980_v61 = vadd.f32 %v914_v42, %v2875_v57  ;;  %v1278_v57 = vmul.f32 %v2956_v47, %v2956_v47 }
 0x15f   : > { %v922_v51 = vpop.f32.mrf.mxu0  ;;  %v1023_v30 = vpop.f32.mrf.mxu1  ;;  %v1295_v36 = vmul.f32 %v2958_v32, %v2958_v32  ;;  %v1286_v42 = vmul.f32 %v2970_v55, %v2970_v55 }
 0x160   : > { %3591 = vst [vmem:[#allocation21_spill] sm:$0xff] %v2960_v23  ;;  %3592 = vst [vmem:[#allocation22_spill] sm:$0xff] %v2962_v45  ;;  %v2973_v49 = vadd.f32 %v922_v51, %v2881_v63  ;;  %v2983_v62 = vadd.f32 %v1023_v30, %v2883_v1  ;;  %v1287_v63 = vmul.f32 %v2953_v24, %v2953_v24 }
 0x161   : > { %v926_v48 = vpop.f32.mrf.mxu0  ;;  %v1027_v26 = vpop.f32.mrf.mxu1  ;;  %v2998_v1 = vadd.f32 %v1003_v35, %v2865_v50  ;;  %v1272_v50 = vmul.f32 %v2949_v7, %v2949_v7  ;;  %v1294_v51 = vmul.f32 %v2980_v61, %v2980_v61  ;;  %v3019_v30 = vadd.f32 %v1015_v43, %v2877_v58 }
 0x162   : > { %3593 = vst [vmem:[#allocation23_spill] sm:$0xff] %v2973_v49  ;;  %3594 = vst [vmem:[#allocation24_spill] sm:$0xff] %v2983_v62  ;;  %v2990_v27 = vadd.f32 %v926_v48, %v2885_v2  ;;  %v2993_v33 = vadd.f32 %v1027_v26, %v2887_v3  ;;  %v3005_v2 = vadd.f32 %v1009_v39, %v2871_v54 }
 0x163   : > { %v928_v38 = vpop.f32.mrf.mxu0  ;;  %v1029_v40 = vpop.f32.mrf.mxu1  ;;  %v1244_v35 = vadd.f32 %v1243_v59, %v2998_v1  ;;  %v1311_v39 = vadd.f32 %v1279_v53, %v1278_v57  ;;  %v1320_v48 = vadd.f32 %v1287_v63, %v1286_v42  ;;  %v1235_v26 = vadd.f32 %v1234_v0, %v2949_v7 }
 0x164   : > { %v3008_v3 = vadd.f32 %v928_v38, %v2889_v4  ;;  %v3011_v25 = vadd.f32 %v1029_v40, %v2891_v5  ;;  %v1273_v4 = vmul.f32 %v2967_v31, %v2967_v31  ;;  %v1252_v5 = vadd.f32 %v2953_v24, %v2970_v55 }
 0x165   : > { %v1098_v46 = vpop.f32.mrf.mxu0  ;;  %v3021_v54 = vpop.f32.mrf.mxu1  ;;  %v3029_v59 = vadd.f32 %v1005_v37, %v2867_v52  ;;  %v1261_v58 = vadd.f32 %v2958_v32, %v2980_v61  ;;  %v1329_v43 = vadd.f32 %v1295_v36, %v1294_v51  ;;  %v1303_v62 = vadd.f32 %v1302_v34, %v1272_v50 }
 0x166   : > { %v1280_v53 = vmul.f32 %v2998_v1, %v2998_v1  ;;  %v1288_v57 = vmul.f32 %v3005_v2, %v3005_v2  ;;  %v3040_v63 = vadd.f32 %v1011_v41, %v2873_v56  ;;  %v1296_v37 = vmul.f32 %v3019_v30, %v3019_v30 }
 0x167   : > { %v1100_v38 = vpop.f32.mrf.mxu0  ;;  %v3033_v40 = vpop.f32.mrf.mxu1  ;;  %v1245_v52 = vadd.f32 %v1244_v35, %v3029_v59  ;;  %v3046_v0 = vadd.f32 %v1017_v28, %v2879_v60  ;;  %v3049_v36 = vadd.f32 %v1098_v46, %v2893_v6  ;;  %v1253_v51 = vadd.f32 %v1252_v5, %v3005_v2 }
 0x168   : > { %v1312_v50 = vadd.f32 %v1311_v39, %v1280_v53  ;;  %v1321_v45 = vadd.f32 %v1320_v48, %v1288_v57  ;;  %v1236_v41 = vadd.f32 %v1235_v26, %v2967_v31  ;;  %v1281_v35 = vmul.f32 %v3029_v59, %v3029_v59 }
 0x169   : > { %v1104_v34 = vpop.f32.mrf.mxu0  ;;  %v1205_v42 = vpop.f32.mrf.mxu1  ;;  %v1262_v60 = vadd.f32 %v1261_v58, %v3019_v30  ;;  %v1330_v28 = vadd.f32 %v1329_v43, %v1296_v37  ;;  %v1304_v46 = vadd.f32 %v1303_v62, %v1273_v4  ;;  %v1289_v39 = vmul.f32 %v3040_v63, %v3040_v63 }
 0x16a   : > { %v3053_v56 = vadd.f32 %v1104_v34, %v2901_v10  ;;  %v1297_v10 = vmul.f32 %v3046_v0, %v3046_v0  ;;  %v1237_v26 = vadd.f32 %v1236_v41, %v3049_v36  ;;  %v1274_v58 = vmul.f32 %v3049_v36, %v3049_v36 }
 0x16b   : > { %v1106_v49 = vpop.f32.mrf.mxu0  ;;  %v1207_v6 = vpop.f32.mrf.mxu1  ;;  %v3071_v43 = vadd.f32 %v1100_v38, %v2897_v8  ;;  %v1313_v53 = vadd.f32 %v1312_v50, %v1281_v35  ;;  %v1254_v57 = vadd.f32 %v1253_v51, %v3040_v63  ;;  %v3079_v34 = vadd.f32 %v1205_v42, %v2903_v11 }
 0x16c   : > { %v1246_v5 = vadd.f32 %v1245_v52, %v3053_v56  ;;  %v3063_v48 = vadd.f32 %v1106_v49, %v2905_v12  ;;  %v1322_v52 = vadd.f32 %v1321_v45, %v1289_v39  ;;  %v1263_v49 = vadd.f32 %v1262_v60, %v3046_v0 }
 0x16d   : > { %v1110_v62 = vpop.f32.mrf.mxu0  ;;  %v1211_v4 = vpop.f32.mrf.mxu1  ;;  %v1331_v37 = vadd.f32 %v1330_v28, %v1297_v10  ;;  %v1282_v38 = vmul.f32 %v3053_v56, %v3053_v56  ;;  %v1305_v51 = vadd.f32 %v1304_v46, %v1274_v58  ;;  %v1238_v35 = vadd.f32 %v1237_v26, %v3071_v43 }
 0x16e   : > { %v3075_v12 = vadd.f32 %v1110_v62, %v2909_v14  ;;  %v1247_v8 = vadd.f32 %v1246_v5, %v3063_v48  ;;  %v3092_v11 = vadd.f32 %v1207_v6, %v2907_v13  ;;  %v1275_v39 = vmul.f32 %v3071_v43, %v3071_v43 }
 0x16f   : > { %v1112_v41 = vpop.f32.mrf.mxu0  ;;  %v1213_v23 = vpop.f32.mrf.mxu1  ;;  %v3098_v10 = vadd.f32 %v1211_v4, %v2911_v15  ;;  %v1283_v4 = vmul.f32 %v3063_v48, %v3063_v48 }
 0x170   : > { %v1255_v50 = vadd.f32 %v1254_v57, %v3075_v12  ;;  %v1290_v45 = vmul.f32 %v3075_v12, %v3075_v12  ;;  %v3088_v14 = vadd.f32 %v1112_v41, %v2913_v16  ;;  %v1248_v28 = vadd.f32 %v1247_v8, %v3079_v34 }
 0x171   : > { %v1116_v42 = vpop.f32.mrf.mxu0  ;;  %v1217_v60 = vpop.f32.mrf.mxu1  ;;  %v1314_v57 = vadd.f32 %v1313_v53, %v1282_v38 }
 0x172   : > { %v1323_v5 = vadd.f32 %v1322_v52, %v1290_v45  ;;  %v3101_v16 = vadd.f32 %v1116_v42, %v2917_v18  ;;  %v1291_v46 = vmul.f32 %v3088_v14, %v3088_v14  ;;  %v3106_v13 = vadd.f32 %v1217_v60, %v2919_v19 }
 0x173   : > { %v1118_v6 = vpop.f32.mrf.mxu0  ;;  %v1219_v26 = vpop.f32.mrf.mxu1  ;;  %v1249_v58 = vadd.f32 %v1248_v28, %v3092_v11  ;;  %v1256_v62 = vadd.f32 %v1255_v50, %v3088_v14  ;;  %v3119_v19 = vadd.f32 %v1213_v23, %v2915_v17  ;;  %v3595_v23 = vld [vmem:[#allocation14_spill] sm:$0xff] }
 0x174   : > { %v1264_v52 = vadd.f32 %v1263_v49, %v3101_v16  ;;  %v1298_v15 = vmul.f32 %v3101_v16, %v3101_v16  ;;  %v3114_v18 = vadd.f32 %v1118_v6, %v2921_v20  ;;  %v3122_v41 = vadd.f32 %v1219_v26, %v2923_v21 }
 0x175   : > { %1250 = vadd.xlane.f32.xlu1 %v1249_v58  ;;  %v1122_v8 = vpop.f32.mrf.mxu0  ;;  %v1223_v53 = vpop.f32.mrf.mxu1  ;;  %v1257_v49 = vadd.f32 %v1256_v62, %v3098_v10  ;;  %v1300_v17 = vmul.f32 %v3106_v13, %v3106_v13  ;;  %v1324_v6 = vadd.f32 %v1323_v5, %v1291_v46  ;;  %v3599_v58 = vld [vmem:[#allocation16_spill] sm:$0xff]  ;;  %v3602_v46 = vld [vmem:[#allocation17_spill] sm:$0xff] }
 0x176   : > { %v1332_v38 = vadd.f32 %v1331_v37, %v1298_v15  ;;  %v1265_v50 = vadd.f32 %v1264_v52, %v3114_v18  ;;  %v1299_v20 = vmul.f32 %v3114_v18, %v3114_v18  ;;  %v3129_v45 = vadd.f32 %v1122_v8, %v2925_v22  ;;  %v3597_v37 = vld [vmem:[#allocation15_spill] sm:$0xff]  ;;  %v3601_v15 = vld [vmem:[#allocation12_spill] sm:$0xff] }
 0x177   : > { %v3134_v21 = vadd.f32 %v1223_v53, %v3595_v23  ;;  %v1124_v42 = vpop.f32.mrf.mxu0  ;;  %v1225_v60 = vpop.f32.mrf.mxu1  ;;  %v1258_v28 = vadd.f32 %v1257_v49, %v3119_v19  ;;  %v3146_v8 = vadd.f32 %v3021_v54, %v3601_v15  ;;  %v1292_v53 = vmul.f32 %v3098_v10, %v3098_v10 }
 0x178   : > { %v3138_v26 = vadd.f32 %v1124_v42, %v3597_v37  ;;  %v3141_v62 = vadd.f32 %v1225_v60, %v3599_v58  ;;  %v1266_v22 = vadd.f32 %v1265_v50, %v3106_v13  ;;  %v1333_v52 = vadd.f32 %v1332_v38, %v1299_v20  ;;  %v3603_v60 = vld [vmem:[#allocation18_spill] sm:$0xff] }
 0x179   : > { %3596 = vst [vmem:[#allocation14_spill] sm:$0xff] %v3134_v21  ;;  %1259 = vadd.xlane.f32.xlu0 %v1258_v28  ;;  %v1128_v23 = vpop.f32.mrf.mxu0  ;;  %v1229_v49 = vpop.f32.mrf.mxu1  ;;  %v1301_v5 = vmul.f32 %v3122_v41, %v3122_v41  ;;  %v1325_v54 = vadd.f32 %v1324_v6, %v1292_v53  ;;  %v1315_v20 = vadd.f32 %v1314_v57, %v1283_v4 }
 0x17a   : > { %3598 = vst [vmem:[#allocation15_spill] sm:$0xff] %v3138_v26  ;;  %3600 = vst [vmem:[#allocation16_spill] sm:$0xff] %v3141_v62  ;;  %v3153_v42 = vadd.f32 %v1128_v23, %v3602_v46  ;;  %v3156_v37 = vadd.f32 %v1229_v49, %v3603_v60  ;;  %v1267_v38 = vadd.f32 %v1266_v22, %v3122_v41  ;;  %v3604_v46 = vld [vmem:[#allocation13_spill] sm:$0xff] }
 0x17b   : > { %v1334_v50 = vadd.f32 %v1333_v52, %v1300_v17  ;;  %v1239_v15 = vadd.f32 %v1238_v35, %v3146_v8  ;;  %v1306_v28 = vadd.f32 %v1305_v51, %v1275_v39  ;;  %v1284_v62 = vmul.f32 %v3079_v34, %v3079_v34 }
 0x17c   : > { %v1293_v23 = vmul.f32 %v3119_v19, %v3119_v19  ;;  %v1276_v49 = vmul.f32 %v3146_v8, %v3146_v8  ;;  %v3168_v22 = vadd.f32 %v3033_v40, %v3604_v46  ;;  %v1285_v39 = vmul.f32 %v3092_v11, %v3092_v11 }
 0x17d   : > { %v1335_v58 = vadd.f32 %v1334_v50, %v1301_v5  ;;  %1268 = vadd.xlane.f32.xlu0 %v1267_v38  ;;  %v1316_v4 = vadd.f32 %v1315_v20, %v1284_v62  ;;  %v3568_v40 = vmov 0  }
 0x17e   : > { %v1326_v57 = vadd.f32 %v1325_v54, %v1293_v23  ;;  %v1240_v35 = vadd.f32 %v1239_v15, %v3168_v22  ;;  %v1307_v51 = vadd.f32 %v1306_v28, %v1276_v49  ;;  %v1277_v17 = vmul.f32 %v3168_v22, %v3168_v22  ;;  %2319 = vset.pattern.permute.xlu0 %v3568_v40 }
 0x17f   : > { %1336 = vadd.xlane.f32.xlu1 %v1335_v58  ;;  %v1317_v6 = vadd.f32 %v1316_v4, %v1285_v39 }
 0x180   : > { %v1308_v52 = vadd.f32 %v1307_v51, %v1277_v17  ;;  %2320 = vset.pattern.permute.xlu1 %v3568_v40 }
 0x181   : > { %1327 = vadd.xlane.f32.xlu0 %v1326_v57 }
 0x183   : > { %1241 = vadd.xlane.f32.xlu1 %v1240_v35 }
 0x185   : > { %1318 = vadd.xlane.f32.xlu0 %v1317_v6 }
 0x187   : > { %1309 = vadd.xlane.f32.xlu1 %v1308_v52 }
 0x1fe   : > { %v1251_v53 = vpop.xlane.xlu1 %1250 }
 0x1ff   : > { %v1339_v15 = vmul.f32 0.0009765625, %v1251_v53 }
 0x201   : > { %v1347_v39 = vmul.f32 %v1339_v15, %v1339_v15 }
 0x202   : > { %v1260_v62 = vpop.xlane.xlu0 %1259 }
 0x203   : > { %v1340_v60 = vmul.f32 0.0009765625, %v1260_v62 }
 0x205   : > { %v1348_v28 = vmul.f32 %v1340_v60, %v1340_v60 }
 0x206   : > { %v1269_v5 = vpop.xlane.xlu0 %1268 }
 0x207   : > { %v1341_v38 = vmul.f32 0.0009765625, %v1269_v5 }
 0x208   : > { %v1337_v50 = vpop.xlane.xlu1 %1336 }
 0x209   : > { %v1345_v54 = vmul.f32 0.0009765625, %v1337_v50  ;;  %v1349_v20 = vmul.f32 %v1341_v38, %v1341_v38 }
 0x20a   : > { %v1328_v58 = vpop.xlane.xlu0 %1327 }
 0x20b   : > { %v1353_v23 = vsub.f32 %v1345_v54, %v1349_v20  ;;  %v1344_v49 = vmul.f32 0.0009765625, %v1328_v58 }
 0x20c   : > { %v1242_v46 = vpop.xlane.xlu1 %1241 }
 0x20d   : > { %v1338_v57 = vmul.f32 0.0009765625, %v1242_v46  ;;  %v1357_v4 = vmax.f32 %v1353_v23, 0.0  ;;  %v1352_v35 = vsub.f32 %v1344_v49, %v1348_v28  ;;  %v354_v28 = vld [vmem:[%s3558_s5 + $0x18] sm:$0xff] }
 0x20e   : > { %v1319_v51 = vpop.xlane.xlu0 %1318 }
 0x20f   : > { %v1361_v17 = vadd.f32 1e-05, %v1357_v4  ;;  %v1356_v6 = vmax.f32 %v1352_v35, 0.0  ;;  %v1343_v52 = vmul.f32 0.0009765625, %v1319_v51  ;;  %v1346_v62 = vmul.f32 %v1338_v57, %v1338_v57 }
 0x210   : > { %v1310_v40 = vpop.xlane.xlu1 %1309 }
 0x211   : > { %v1342_v5 = vmul.f32 0.0009765625, %v1310_v40  ;;  %2325 = vrsqrt.f32 %v1361_v17  ;;  %v1360_v50 = vadd.f32 1e-05, %v1356_v6  ;;  %v1351_v21 = vsub.f32 %v1343_v52, %v1347_v39  ;;  %v353_v40 = vld [vmem:[%s3558_s5 + $0x10] sm:$0xff]  ;;  %v351_v39 = vld [vmem:[%s3558_s5] sm:$0xff] }
 0x213   : > { %v1350_v26 = vsub.f32 %v1342_v5, %v1346_v62  ;;  %2327 = vrsqrt.f32 %v1360_v50  ;;  %v1355_v53 = vmax.f32 %v1351_v21, 0.0  ;;  %v352_v21 = vld [vmem:[%s3558_s5 + $0x8] sm:$0xff] }
 0x215   : > { %v1354_v54 = vmax.f32 %v1350_v26, 0.0  ;;  %v1359_v20 = vadd.f32 1e-05, %v1355_v53 }
 0x217   : > { %v1358_v58 = vadd.f32 1e-05, %v1354_v54  ;;  %2329 = vrsqrt.f32 %v1359_v20 }
 0x219   : > { %2331 = vrsqrt.f32 %v1358_v58 }
 0x21e   : > { %v2326_v23 = vpop.eup %2325 }
 0x21f   : > { %v1369_v49 = vmul.f32 %v2326_v23, %v354_v28 }
 0x220   : > { %v2328_v46 = vpop.eup %2327 }
 0x221   : > { %v1373_v4 = vmul.f32 %v1369_v49, %v1341_v38  ;;  %v1368_v35 = vmul.f32 %v2328_v46, %v353_v40 }
 0x223   : > { %1384 = vrot.lane.b32.xlu0 %v1373_v4, %s2469_s20  ;;  %v1372_v26 = vmul.f32 %v1368_v35, %v1340_v60  ;;  %v2470_v60 = vmov 1  }
 0x224   : > { %v2330_v51 = vpop.eup %2329 }
 0x225   : > { %1382 = vrot.lane.b32.xlu1 %v1372_v26, %s2469_s20  ;;  %v1367_v6 = vmul.f32 %v2330_v51, %v352_v21 }
 0x226   : > { %v2332_v17 = vpop.eup %2331 }
 0x227   : > { %1411 = vperm.xlu0 %2319, %v1369_v49   ;;  %v1371_v38 = vmul.f32 %v1367_v6, %v1339_v15  ;;  %v1366_v52 = vmul.f32 %v2332_v17, %v351_v39 }
 0x229   : > { %1380 = vrot.lane.b32.xlu1 %v1371_v38, %s2469_s20  ;;  %v1370_v62 = vmul.f32 %v1366_v52, %v1338_v57  ;;  %v3605_v57 = vmov 0  }
 0x22b   : > { %1401 = vperm.xlu0 %2319, %v1367_v6  }
 0x22d   : > { %1378 = vrot.lane.b32.xlu1 %v1370_v62, %s2469_s20 }
 0x22f   : > { %1396 = vperm.xlu0 %2319, %v1366_v52  }
 0x231   : > { %1406 = vperm.xlu1 %2320, %v1368_v35  }
 0x233   : > { %2322 = vset.pattern.permute.xlu0 %v2470_v60 }
 0x235   : > { %2321 = vset.pattern.permute.xlu1 %v2470_v60 }
 0x295   : > { %v1385_v53 = vpop.permute.xlu0 %1384 }
 0x296   : > { %v1393_v15 = vsub.f32 %v354_v28, %v1385_v53 }
 0x297   : > { %v1383_v5 = vpop.permute.xlu1 %1382 }
 0x298   : > { %v1392_v50 = vsub.f32 %v353_v40, %v1383_v5 }
 0x29a   : > { %1458 = vperm.xlu1 %2321, %v1392_v50  }
 0x29b   : > { %v1381_v54 = vpop.permute.xlu1 %1380 }
 0x29c   : > { %v1391_v58 = vsub.f32 %v352_v21, %v1381_v54 }
 0x29e   : > { %1463 = vperm.xlu1 %2321, %v1393_v15  }
 0x29f   : > { %v1379_v20 = vpop.permute.xlu1 %1378 }
 0x2a0   : > { %v1390_v23 = vsub.f32 %v351_v39, %v1379_v20 }
 0x2a2   : > { %1453 = vperm.xlu1 %2321, %v1391_v58   ;;  %1448 = vperm.xlu0 %2322, %v1390_v23   ;;  %v1412_v49 = vpop.permute.xlu0 %1411 }
 0x2a3   : > { %v1439_v4 = vmul.f32 %v1412_v49, %v2958_v32  ;;  %v1441_v35 = vmul.f32 %v1412_v49, %v3046_v0  ;;  %v1438_v40 = vmul.f32 %v1412_v49, %v2980_v61  ;;  %v1440_v51 = vmul.f32 %v1412_v49, %v3019_v30 }
 0x2a4   : > { %v1443_v28 = vmul.f32 %v1412_v49, %v3114_v18  ;;  %v1445_v21 = vmul.f32 %v1412_v49, %v3122_v41  ;;  %v1442_v6 = vmul.f32 %v1412_v49, %v3101_v16  ;;  %v1444_v32 = vmul.f32 %v1412_v49, %v3106_v13 }
 0x2a6   : > { %2323 = vset.pattern.permute.xlu1 %v3605_v57  ;;  %v1402_v46 = vpop.permute.xlu0 %1401 }
 0x2a7   : > { %v3203_v39 = vmul.f32 %v1402_v46, %v2946_v9  ;;  %v3206_v17 = vmul.f32 %v1402_v46, %v3029_v59  ;;  %v3211_v38 = vmul.f32 %v1402_v46, %v2956_v47  ;;  %v3214_v61 = vmul.f32 %v1402_v46, %v2998_v1 }
 0x2a8   : > { %v3217_v30 = vmul.f32 %v1402_v46, %v3063_v48  ;;  %v3220_v9 = vmul.f32 %v1402_v46, %v3092_v11  ;;  %v3229_v13 = vmul.f32 %v1402_v46, %v3053_v56  ;;  %v3232_v47 = vmul.f32 %v1402_v46, %v3079_v34 }
 0x2aa   : > { %v1397_v26 = vpop.permute.xlu0 %1396 }
 0x2ab   : > { %v3223_v59 = vmul.f32 %v1397_v26, %v2941_v44  ;;  %v3226_v16 = vmul.f32 %v1397_v26, %v2967_v31  ;;  %v1414_v1 = vmul.f32 %v1397_v26, %v2944_v29  ;;  %v3236_v48 = vmul.f32 %v1397_v26, %v2949_v7 }
 0x2ac   : > { %v1407_v0 = vpop.permute.xlu1 %1406  ;;  %v3239_v11 = vmul.f32 %v1397_v26, %v3071_v43  ;;  %v3242_v44 = vmul.f32 %v1397_v26, %v3168_v22  ;;  %v3252_v43 = vmul.f32 %v1397_v26, %v3049_v36 }
 0x2ad   : > { %v1431_v31 = vmul.f32 %v1407_v0, %v2953_v24  ;;  %v1433_v18 = vmul.f32 %v1407_v0, %v3040_v63  ;;  %v1430_v56 = vmul.f32 %v1407_v0, %v2970_v55  ;;  %v1432_v34 = vmul.f32 %v1407_v0, %v3005_v2 }
 0x2ae   : > { %v1435_v29 = vmul.f32 %v1407_v0, %v3088_v14  ;;  %v1437_v7 = vmul.f32 %v1407_v0, %v3119_v19  ;;  %v1434_v52 = vmul.f32 %v1407_v0, %v3075_v12  ;;  %v1436_v55 = vmul.f32 %v1407_v0, %v3098_v10 }
 0x2af   : > { %v3260_v2 = vmul.f32 %v1397_v26, %v3146_v8 }
 0x315   : > { %v1459_v41 = vpop.permute.xlu1 %1458 }
 0x316   : > { %v1483_v22 = vadd.f32 %v1459_v41, %v1431_v31  ;;  %v1485_v62 = vadd.f32 %v1459_v41, %v1433_v18  ;;  %v1482_v5 = vadd.f32 %v1459_v41, %v1430_v56  ;;  %v1484_v24 = vadd.f32 %v1459_v41, %v1432_v34 }
 0x317   : > { %v3254_v50 = vadd.f32 %v1459_v41, %v1435_v29  ;;  %v3256_v63 = vadd.f32 %v1459_v41, %v1437_v7  ;;  %v3262_v12 = vadd.f32 %v1459_v41, %v1434_v52  ;;  %v3270_v58 = vadd.f32 %v1459_v41, %v1436_v55 }
 0x318   : > { %v1515_v14 = vmul.f32 0.1, %v1483_v22  ;;  %v1517_v19 = vmul.f32 0.1, %v1485_v62  ;;  %v1514_v53 = vmul.f32 0.1, %v1482_v5 }
 0x319   : > { %v1464_v36 = vpop.permute.xlu1 %1463  ;;  %v1516_v54 = vmul.f32 0.1, %v1484_v24  ;;  %v3265_v15 = vmul.f32 0.1, %v3254_v50  ;;  %v3268_v20 = vmul.f32 0.1, %v3256_v63 }
 0x31a   : > { %v1491_v23 = vadd.f32 %v1464_v36, %v1439_v4  ;;  %v1493_v10 = vadd.f32 %v1464_v36, %v1441_v35  ;;  %v1490_v57 = vadd.f32 %v1464_v36, %v1438_v40  ;;  %v1492_v8 = vadd.f32 %v1464_v36, %v1440_v51 }
 0x31b   : > { %v1547_v49 = vmax.f32 %v1483_v22, %v1515_v14  ;;  %v1549_v46 = vmax.f32 %v1485_v62, %v1517_v19  ;;  %v1546_v26 = vmax.f32 %v1482_v5, %v1514_v53  ;;  %v1548_v0 = vmax.f32 %v1484_v24, %v1516_v54 }
 0x31c   : > { %v1523_v31 = vmul.f32 0.1, %v1491_v23  ;;  %v1525_v18 = vmul.f32 0.1, %v1493_v10  ;;  %v1522_v56 = vmul.f32 0.1, %v1490_v57  ;;  %v3272_v34 = vadd.f32 %v1464_v36, %v1443_v28 }
 0x31d   : > { %v3274_v29 = vpop.permute.xlu0 %1448  ;;  %v3276_v7 = vpop.permute.xlu1 %1453  ;;  %v1524_v52 = vmul.f32 0.1, %v1492_v8  ;;  %v3278_v41 = vadd.f32 %v1464_v36, %v1445_v21  ;;  %v3280_v4 = vadd.f32 %v1464_v36, %v1442_v6  ;;  %v3282_v35 = vadd.f32 %v1464_v36, %v1444_v32 }
 0x31e   : > { %v1555_v40 = vmax.f32 %v1491_v23, %v1523_v31  ;;  %v1557_v51 = vmax.f32 %v1493_v10, %v1525_v18  ;;  %v1554_v22 = vmax.f32 %v1490_v57, %v1522_v56  ;;  %v1475_v62 = vadd.f32 %v3276_v7, %v3203_v39 }
 0x31f   : > { %v1556_v28 = vmax.f32 %v1492_v8, %v1524_v52  ;;  %v1477_v5 = vadd.f32 %v3276_v7, %v3206_v17  ;;  %v1474_v24 = vadd.f32 %v3276_v7, %v3211_v38  ;;  %v1476_v21 = vadd.f32 %v3276_v7, %v3214_v61 }
 0x320   : > { %1593 = vmatprep.subr.mxu0 %v1555_v40  ;;  %1670 = vmatprep.subr.mxu1 %v1557_v51  ;;  %v1507_v6 = vmul.f32 0.1, %v1475_v62  ;;  %v1467_v32 = vadd.f32 %v3274_v29, %v3223_v59  ;;  %v1469_v55 = vadd.f32 %v3274_v29, %v3226_v16  ;;  %v1466_v39 = vadd.f32 %v3274_v29, %v1414_v1 }
 0x321   : > { %1594 = vmatpush1.msra.mxu0 %v1554_v22  ;;  %1671 = vmatpush1.msra.mxu1 %v1556_v28  ;;  %v1509_v17 = vmul.f32 0.1, %v1477_v5  ;;  %v1506_v14 = vmul.f32 0.1, %v1474_v24  ;;  %v1508_v19 = vmul.f32 0.1, %v1476_v21  ;;  %v1468_v38 = vadd.f32 %v3274_v29, %v3236_v48 }
 0x322   : > { %1595 = vmatprep.subr.mxu0 %v1547_v49  ;;  %1672 = vmatprep.subr.mxu1 %v1549_v46  ;;  %v1539_v61 = vmax.f32 %v1475_v62, %v1507_v6  ;;  %v1499_v53 = vmul.f32 0.1, %v1467_v32  ;;  %v1501_v36 = vmul.f32 0.1, %v1469_v55  ;;  %v1498_v54 = vmul.f32 0.1, %v1466_v39 }
 0x323   : > { %1596 = vmatpush1.msra.mxu0 %v1546_v26  ;;  %1673 = vmatpush1.msra.mxu1 %v1548_v0  ;;  %v1541_v59 = vmax.f32 %v1477_v5, %v1509_v17  ;;  %v1538_v16 = vmax.f32 %v1474_v24, %v1506_v14  ;;  %v1540_v23 = vmax.f32 %v1476_v21, %v1508_v19  ;;  %v1500_v1 = vmul.f32 0.1, %v1468_v38  ;;  %v3302_v48 = vld [vmem:[%s3557_s4] sm:$0xff]  ;;  %v3357_v14 = vpop.f32.mrf.mxu0  ;;  %v3359_v19 = vpop.f32.mrf.mxu1 }
 0x324   : > { %1597 = vmatprep.subr.mxu0 %v1539_v61  ;;  %v1531_v10 = vmax.f32 %v1467_v32, %v1499_v53  ;;  %v1533_v57 = vmax.f32 %v1469_v55, %v1501_v36  ;;  %v1530_v8 = vmax.f32 %v1466_v39, %v1498_v54  ;;  %v1527_v49 = vmul.f32 0.1, %v3272_v34 }
 0x325   : > { %1674 = vmatprep.subr.mxu1 %v1541_v59  ;;  %1598 = vmatpush1.msra.mxu0 %v1538_v16  ;;  %v1532_v46 = vmax.f32 %v1468_v38, %v1500_v1  ;;  %v1529_v26 = vmul.f32 0.1, %v3278_v41  ;;  %v1526_v0 = vmul.f32 0.1, %v3280_v4  ;;  %v1528_v31 = vmul.f32 0.1, %v3282_v35 }
 0x326   : > { %1675 = vmatpush1.msra.mxu1 %v1540_v23  ;;  %1599 = vmatprep.subr.mxu0 %v1531_v10  ;;  %v1559_v18 = vmax.f32 %v3272_v34, %v1527_v49  ;;  %v1551_v56 = vmax.f32 %v3254_v50, %v3265_v15  ;;  %v1553_v52 = vmax.f32 %v3256_v63, %v3268_v20  ;;  %v1518_v40 = vmul.f32 0.1, %v3262_v12 }
 0x327   : > { %1676 = vmatprep.subr.mxu1 %v1533_v57  ;;  %1600 = vmatpush1.msra.mxu0 %v1530_v8  ;;  %v1561_v51 = vmax.f32 %v3278_v41, %v1529_v26  ;;  %v1558_v22 = vmax.f32 %v3280_v4, %v1526_v0  ;;  %v1560_v62 = vmax.f32 %v3282_v35, %v1528_v31  ;;  %v1520_v28 = vmul.f32 0.1, %v3270_v58 }
 0x328   : > { %1677 = vmatpush1.msra.mxu1 %v1532_v46  ;;  %2244 = vmatmul.mubr.msk.f32.vlgmr.msra.gmra.mxu0 %vm1562_vm1, %v3302_v48  ;;  %v1550_v50 = vmax.f32 %v3262_v12, %v1518_v40  ;;  %v1479_v63 = vadd.f32 %v3276_v7, %v3217_v30  ;;  %v1481_v15 = vadd.f32 %v3276_v7, %v3220_v9  ;;  %v3606_v5 = vmov 0.0  }
 0x329   : > { %1747 = vmatprep.subr.mxu0 %v1559_v18  ;;  %1824 = vmatprep.subr.mxu1 %v1561_v51  ;;  %v1552_v20 = vmax.f32 %v3270_v58, %v1520_v28  ;;  %v1478_v34 = vadd.f32 %v3276_v7, %v3229_v13  ;;  %v1480_v41 = vadd.f32 %v3276_v7, %v3232_v47  ;;  %v350_v13 = vld [vmem:[%s3557_s4 + $0x8] sm:$0xff] }
 0x32a   : > { %2246 = vmatmul.mubr.msk.f32.vlgmr.msra.gmra.mxu1 %vm1562_vm1, %v3302_v48  ;;  %1748 = vmatpush1.msra.mxu0 %v1558_v22  ;;  %v1511_v12 = vmul.f32 0.1, %v1479_v63  ;;  %v1513_v4 = vmul.f32 0.1, %v1481_v15  ;;  %v1471_v30 = vadd.f32 %v3274_v29, %v3239_v11  ;;  %v1473_v9 = vadd.f32 %v3274_v29, %v3242_v44 }
 0x32b   : > { %1825 = vmatpush1.msra.mxu1 %v1560_v62  ;;  %1749 = vmatprep.subr.mxu0 %v1551_v56  ;;  %v1510_v58 = vmul.f32 0.1, %v1478_v34  ;;  %v1512_v47 = vmul.f32 0.1, %v1480_v41  ;;  %v1470_v7 = vadd.f32 %v3274_v29, %v3252_v43  ;;  %v1472_v35 = vadd.f32 %v3274_v29, %v3260_v2 }
 0x32c   : > { %1826 = vmatprep.subr.mxu1 %v1553_v52  ;;  %1639 = vmatprep.mubr.f32.mxu0 %v3606_v5  ;;  %v1543_v11 = vmax.f32 %v1479_v63, %v1511_v12  ;;  %v1503_v24 = vmul.f32 0.1, %v1471_v30  ;;  %v1505_v44 = vmul.f32 0.1, %v1473_v9  ;;  %v1545_v21 = vmax.f32 %v1481_v15, %v1513_v4 }
 0x32d   : > { %1750 = vmatpush1.msra.mxu0 %v1550_v50  ;;  %1827 = vmatpush1.msra.mxu1 %v1552_v20  ;;  %v1542_v6 = vmax.f32 %v1478_v34, %v1510_v58  ;;  %v1502_v32 = vmul.f32 0.1, %v1470_v7  ;;  %v1504_v55 = vmul.f32 0.1, %v1472_v35  ;;  %v1544_v39 = vmax.f32 %v1480_v41, %v1512_v47 }
 0x32e   : > { %2245 = vmatmul.mubr.msk.f32.gmra.mxu0 %vm1562_vm1, %v350_v13  ;;  %1751 = vmatprep.subr.mxu0 %v1543_v11  ;;  %v1535_v43 = vmax.f32 %v1471_v30, %v1503_v24  ;;  %v1537_v2 = vmax.f32 %v1473_v9, %v1505_v44 }
 0x32f   : > { %1828 = vmatprep.subr.mxu1 %v1545_v21  ;;  %1752 = vmatpush1.msra.mxu0 %v1542_v6  ;;  %v1534_v29 = vmax.f32 %v1470_v7, %v1502_v32  ;;  %v1536_v17 = vmax.f32 %v1472_v35, %v1504_v55 }
 0x330   : > { %1829 = vmatpush1.msra.mxu1 %v1544_v39  ;;  %1753 = vmatprep.subr.mxu0 %v1535_v43 }
 0x331   : > { %1830 = vmatprep.subr.mxu1 %v1537_v2  ;;  %1716 = vmatprep.mubr.f32.mxu1 %v3606_v5 }
 0x332   : > { %1754 = vmatpush1.msra.mxu0 %v1534_v29  ;;  %1787 = vmatprep.mubr.f32.mxu0 %v3606_v5 }
 0x333   : > { %1831 = vmatpush1.msra.mxu1 %v1536_v17  ;;  %2248 = vmatmul.mubr.msk.f32.vlgmr.msra.gmra.mxu0 %vm1562_vm1, %v3302_v48 }
 0x334   : > { %2247 = vmatmul.mubr.msk.f32.gmra.mxu1 %vm1562_vm1, %v350_v13  ;;  %1793 = vmatprep.mubr.f32.mxu0 %v3606_v5 }
 0x335   : > { %1864 = vmatprep.mubr.f32.mxu1 %v3606_v5 }
 0x337   : > { %2249 = vmatmul.mubr.msk.f32.gmra.mxu0 %vm1562_vm1, %v350_v13 }
 0x338   : > { %2250 = vmatmul.mubr.msk.f32.vlgmr.msra.gmra.mxu1 %vm1562_vm1, %v3302_v48 }
 0x339   : > { %1870 = vmatprep.mubr.f32.mxu1 %v3606_v5 }
 0x33c   : > { %2251 = vmatmul.mubr.msk.f32.gmra.mxu1 %vm1562_vm1, %v350_v13 }
 0x3e8   : > { %v3361_v38 = vpop.f32.mrf.mxu0 }
 0x3e9   : > { %v1895_v36 = vmul.f32 %v3361_v38, %v3361_v38 }
 0x3ea   : > { %v3363_v61 = vpop.f32.mrf.mxu0  ;;  %v3365_v53 = vpop.f32.mrf.mxu1 }
 0x3eb   : > { %v1877_v54 = vadd.f32 %v3363_v61, %v3361_v38  ;;  %v1896_v59 = vmul.f32 %v3363_v61, %v3363_v61  ;;  %v1897_v16 = vmul.f32 %v3365_v53, %v3365_v53 }
 0x3ec   : > { %v3376_v10 = vpop.f32.mrf.mxu1 }
 0x3ed   : > { %v1911_v23 = vadd.f32 %v1896_v59, %v1895_v36  ;;  %v1878_v1 = vadd.f32 %v1877_v54, %v3365_v53  ;;  %v1898_v46 = vmul.f32 %v3376_v10, %v3376_v10 }
 0x3ee   : > { %v3378_v57 = vpop.f32.mrf.mxu0 }
 0x3ef   : > { %v1912_v8 = vadd.f32 %v1911_v23, %v1897_v16  ;;  %v1879_v49 = vadd.f32 %v1878_v1, %v3376_v10  ;;  %v1903_v26 = vmul.f32 %v3378_v57, %v3378_v57 }
 0x3f0   : > { %v3380_v48 = vpop.f32.mrf.mxu0 }
 0x3f1   : > { %v1886_v0 = vadd.f32 %v3380_v48, %v3378_v57  ;;  %v1904_v31 = vmul.f32 %v3380_v48, %v3380_v48  ;;  %v1913_v18 = vadd.f32 %v1912_v8, %v1898_v46 }
 0x3f3   : > { %v1920_v56 = vadd.f32 %v1904_v31, %v1903_v26  ;;  %v3391_v52 = vpop.f32.mrf.mxu0 }
 0x3f4   : > { %v3393_v40 = vpop.f32.mrf.mxu1  ;;  %v1880_v51 = vadd.f32 %v1879_v49, %v3391_v52  ;;  %v1899_v22 = vmul.f32 %v3391_v52, %v3391_v52 }
 0x3f5   : > { %v1887_v62 = vadd.f32 %v1886_v0, %v3393_v40  ;;  %v1905_v28 = vmul.f32 %v3393_v40, %v3393_v40  ;;  %v3401_v50 = vpop.f32.mrf.mxu0 }
 0x3f6   : > { %v1914_v63 = vadd.f32 %v1913_v18, %v1899_v22  ;;  %v3403_v15 = vpop.f32.mrf.mxu1  ;;  %v1881_v20 = vadd.f32 %v1880_v51, %v3401_v50  ;;  %v1900_v34 = vmul.f32 %v3401_v50, %v3401_v50 }
 0x3f7   : > { %v1921_v41 = vadd.f32 %v1920_v56, %v1905_v28  ;;  %v1888_v12 = vadd.f32 %v1887_v62, %v3403_v15  ;;  %v1906_v4 = vmul.f32 %v3403_v15, %v3403_v15  ;;  %v3411_v30 = vpop.f32.mrf.mxu0 }
 0x3f8   : > { %v1907_v9 = vmul.f32 %v3411_v30, %v3411_v30  ;;  %v3415_v13 = vpop.f32.mrf.mxu1  ;;  %v1915_v24 = vadd.f32 %v1914_v63, %v1900_v34 }
 0x3f9   : > { %v1922_v58 = vadd.f32 %v1921_v41, %v1906_v4  ;;  %v1889_v47 = vadd.f32 %v1888_v12, %v3411_v30  ;;  %v3418_v7 = vpop.f32.mrf.mxu0  ;;  %v1882_v35 = vadd.f32 %v1881_v20, %v3415_v13  ;;  %v1901_v21 = vmul.f32 %v3415_v13, %v3415_v13  ;;  %v356_v12 = vld [vmem:[%s3559_s6 + $0x8] sm:$0xff] }
 0x3fa   : > { %v1908_v5 = vmul.f32 %v3418_v7, %v3418_v7  ;;  %v3423_v11 = vpop.f32.mrf.mxu1 }
 0x3fb   : > { %v1923_v44 = vadd.f32 %v1922_v58, %v1907_v9  ;;  %v1890_v6 = vadd.f32 %v1889_v47, %v3418_v7  ;;  %v1883_v32 = vadd.f32 %v1882_v35, %v3423_v11  ;;  %v1916_v59 = vadd.f32 %v1915_v24, %v1901_v21  ;;  %v355_v9 = vld [vmem:[%s3559_s6] sm:$0xff] }
 0x3fc   : > { %v3429_v55 = vpop.f32.mrf.mxu1  ;;  %v1902_v23 = vmul.f32 %v3423_v11, %v3423_v11 }
 0x3fd   : > { %v1924_v39 = vadd.f32 %v1923_v44, %v1908_v5  ;;  %v1909_v43 = vmul.f32 %v3429_v55, %v3429_v55  ;;  %1884 = vadd.xlane.f32.xlu1 %v1883_v32  ;;  %v1891_v2 = vadd.f32 %v1890_v6, %v3429_v55 }
 0x3fe   : > { %v3434_v29 = vpop.f32.mrf.mxu1  ;;  %v1917_v1 = vadd.f32 %v1916_v59, %v1902_v23 }
 0x3ff   : > { %v1910_v17 = vmul.f32 %v3434_v29, %v3434_v29  ;;  %v1892_v36 = vadd.f32 %v1891_v2, %v3434_v29  ;;  %v1925_v54 = vadd.f32 %v1924_v39, %v1909_v43  ;;  %v3607_v43 = vld [vmem:[#allocation19_spill] sm:$0xff] }
 0x400   : > { %v1131_v2 = vadd.f32 %v3357_v14, %v3607_v43 }
 0x401   : > { %1893 = vadd.xlane.f32.xlu0 %v1892_v36  ;;  %v1926_v16 = vadd.f32 %v1925_v54, %v1910_v17  ;;  %v3608_v17 = vld [vmem:[#allocation20_spill] sm:$0xff] }
 0x402   : > { %v1232_v36 = vadd.f32 %v3359_v19, %v3608_v17 }
 0x403   : > { %1927 = vadd.xlane.f32.xlu1 %v1926_v16 }
 0x405   : > { %1918 = vadd.xlane.f32.xlu0 %v1917_v1 }
 0x486   : > { %v1885_v8 = vpop.xlane.xlu1 %1884 }
 0x487   : > { %v1929_v46 = vmul.f32 0.0009765625, %v1885_v8 }
 0x489   : > { %v1933_v51 = vmul.f32 %v1929_v46, %v1929_v46 }
 0x48a   : > { %v1894_v49 = vpop.xlane.xlu0 %1893 }
 0x48b   : > { %v1930_v26 = vmul.f32 0.0009765625, %v1894_v49 }
 0x48c   : > { %v1928_v0 = vpop.xlane.xlu1 %1927 }
 0x48d   : > { %v1934_v31 = vmul.f32 %v1930_v26, %v1930_v26  ;;  %v1932_v18 = vmul.f32 0.0009765625, %v1928_v0 }
 0x48e   : > { %v1919_v56 = vpop.xlane.xlu0 %1918 }
 0x48f   : > { %v1936_v22 = vsub.f32 %v1932_v18, %v1934_v31  ;;  %v1931_v62 = vmul.f32 0.0009765625, %v1919_v56 }
 0x491   : > { %v1938_v28 = vmax.f32 %v1936_v22, 0.0  ;;  %v1935_v63 = vsub.f32 %v1931_v62, %v1933_v51 }
 0x493   : > { %v1940_v20 = vadd.f32 1e-05, %v1938_v28  ;;  %v1937_v34 = vmax.f32 %v1935_v63, 0.0 }
 0x495   : > { %2333 = vrsqrt.f32 %v1940_v20  ;;  %v1939_v41 = vadd.f32 1e-05, %v1937_v34 }
 0x497   : > { %2335 = vrsqrt.f32 %v1939_v41 }
 0x4a2   : > { %v2334_v4 = vpop.eup %2333 }
 0x4a3   : > { %v1944_v58 = vmul.f32 %v2334_v4, %v356_v12 }
 0x4a4   : > { %v2336_v47 = vpop.eup %2335 }
 0x4a5   : > { %v1946_v35 = vmul.f32 %v1944_v58, %v1930_v26  ;;  %v1943_v5 = vmul.f32 %v2336_v47, %v355_v9 }
 0x4a7   : > { %1951 = vrot.lane.b32.xlu1 %v1946_v35, %s2469_s20  ;;  %v1945_v24 = vmul.f32 %v1943_v5, %v1929_v46 }
 0x4a9   : > { %1949 = vrot.lane.b32.xlu0 %v1945_v24, %s2469_s20  ;;  %s3498_s20 = scalar_lea.hbm %s3560_s7, %s2259_s17 }
 0x4ab   : > { %1959 = vperm.xlu1 %2323, %v1943_v5  }
 0x4af   : > { %1964 = vperm.xlu1 %2323, %v1944_v58  }
 0x4b3   : > { %2324 = vset.pattern.permute.xlu1 %v2470_v60 }
 0x519   : > { %v1952_v44 = vpop.permute.xlu1 %1951 }
 0x51a   : > { %v1956_v21 = vsub.f32 %v356_v12, %v1952_v44 }
 0x51b   : > { %v1950_v6 = vpop.permute.xlu0 %1949 }
 0x51c   : > { %v1955_v32 = vsub.f32 %v355_v9, %v1950_v6  ;;  %1990 = vperm.xlu1 %2324, %v1956_v21  }
 0x51e   : > { %1985 = vperm.xlu0 %2322, %v1955_v32  }
 0x526   : > { %v1960_v39 = vpop.permute.xlu1 %1959 }
 0x527   : > { %v1967_v59 = vmul.f32 %v1960_v39, %v3361_v38  ;;  %v1968_v16 = vmul.f32 %v1960_v39, %v3363_v61  ;;  %v1969_v60 = vmul.f32 %v1960_v39, %v3365_v53  ;;  %v1970_v23 = vmul.f32 %v1960_v39, %v3376_v10 }
 0x528   : > { %v1971_v1 = vmul.f32 %v1960_v39, %v3391_v52  ;;  %v1972_v8 = vmul.f32 %v1960_v39, %v3401_v50  ;;  %v1973_v49 = vmul.f32 %v1960_v39, %v3415_v13  ;;  %v1974_v14 = vmul.f32 %v1960_v39, %v3423_v11 }
 0x52a   : > { %v1965_v54 = vpop.permute.xlu1 %1964 }
 0x52b   : > { %v1975_v46 = vmul.f32 %v1965_v54, %v3378_v57  ;;  %v1976_v19 = vmul.f32 %v1965_v54, %v3380_v48  ;;  %v1977_v38 = vmul.f32 %v1965_v54, %v3393_v40  ;;  %v1978_v61 = vmul.f32 %v1965_v54, %v3403_v15 }
 0x52c   : > { %v1979_v53 = vmul.f32 %v1965_v54, %v3411_v30  ;;  %v1980_v10 = vmul.f32 %v1965_v54, %v3418_v7  ;;  %v1981_v52 = vmul.f32 %v1965_v54, %v3429_v55  ;;  %v1982_v50 = vmul.f32 %v1965_v54, %v3434_v29 }
 0x597   : > { %v1991_v26 = vpop.permute.xlu1 %1990 }
 0x598   : > { %v2001_v13 = vadd.f32 %v1991_v26, %v1975_v46  ;;  %v2002_v0 = vadd.f32 %v1991_v26, %v1976_v19  ;;  %v2003_v11 = vadd.f32 %v1991_v26, %v1977_v38  ;;  %v2004_v31 = vadd.f32 %v1991_v26, %v1978_v61  ;;  %v3609_v61 = vld [vmem:[#allocation21_spill] sm:$0xff] }
 0x599   : > { %v2005_v57 = vadd.f32 %v1991_v26, %v1979_v53  ;;  %v2006_v18 = vadd.f32 %v1991_v26, %v1980_v10  ;;  %v2007_v48 = vadd.f32 %v1991_v26, %v1981_v52  ;;  %v2008_v56 = vadd.f32 %v1991_v26, %v1982_v50  ;;  %v1986_v40 = vpop.permute.xlu0 %1985  ;;  %v3610_v10 = vld [vmem:[#allocation23_spill] sm:$0xff]  ;;  %v3611_v50 = vld [vmem:[#allocation22_spill] sm:$0xff] }
 0x59a   : > { %v2017_v51 = vmul.f32 0.1, %v2001_v13  ;;  %v2018_v15 = vmul.f32 0.1, %v2002_v0  ;;  %v2019_v22 = vmul.f32 0.1, %v2003_v11  ;;  %v1993_v30 = vadd.f32 %v1986_v40, %v1967_v59 }
 0x59b   : > { %v2020_v62 = vmul.f32 0.1, %v2004_v31  ;;  %v2021_v7 = vmul.f32 0.1, %v2005_v57  ;;  %v2022_v28 = vmul.f32 0.1, %v2006_v18  ;;  %v1994_v55 = vadd.f32 %v1986_v40, %v1968_v16 }
 0x59c   : > { %v2023_v63 = vmul.f32 0.1, %v2007_v48  ;;  %v2024_v29 = vmul.f32 0.1, %v2008_v56  ;;  %v2033_v20 = vmax.f32 %v2001_v13, %v2017_v51  ;;  %v2034_v34 = vmax.f32 %v2002_v0, %v2018_v15  ;;  %v3612_v13 = vld [vmem:[#allocation24_spill] sm:$0xff] }
 0x59d   : > { %v2035_v41 = vmax.f32 %v2003_v11, %v2019_v22  ;;  %v2036_v12 = vmax.f32 %v2004_v31, %v2020_v62  ;;  %v2037_v4 = vmax.f32 %v2005_v57, %v2021_v7  ;;  %v2038_v9 = vmax.f32 %v2006_v18, %v2022_v28  ;;  %v3613_v31 = vld [vmem:[#allocation15_spill] sm:$0xff]  ;;  %v3614_v18 = vld [vmem:[#allocation14_spill] sm:$0xff] }
 0x59e   : > { %v2039_v58 = vmax.f32 %v2007_v48, %v2023_v63  ;;  %v2040_v47 = vmax.f32 %v2008_v56, %v2024_v29  ;;  %v2049_v35 = vadd.f32 %v2033_v20, %v2990_v27  ;;  %v2050_v5 = vadd.f32 %v2034_v34, %v3008_v3  ;;  %v3615_v56 = vld [vmem:[#allocation16_spill] sm:$0xff] }
 0x59f   : > { %v2051_v24 = vadd.f32 %v2035_v41, %v2993_v33  ;;  %v2052_v44 = vadd.f32 %v2036_v12, %v3011_v25  ;;  %v2053_v21 = vadd.f32 %v2037_v4, %v3153_v42  ;;  %v2054_v6 = vadd.f32 %v2038_v9, %v1131_v2 }
 0x5a0   : > { %v2055_v32 = vadd.f32 %v2039_v58, %v3156_v37  ;;  %v2056_v39 = vadd.f32 %v2040_v47, %v1232_v36  ;;  %2065 = vst [vmem:[%s3477_s12 + $0x40] sm:$0xff] %v2049_v35  ;;  %2066 = vst [vmem:[%s3477_s12 + $0x48] sm:$0xff] %v2050_v5  ;;  %v1995_v27 = vadd.f32 %v1986_v40, %v1969_v60  ;;  %v2009_v43 = vmul.f32 0.1, %v1993_v30 }
 0x5a1   : > { %v1996_v33 = vadd.f32 %v1986_v40, %v1970_v23  ;;  %2067 = vst [vmem:[%s3477_s12 + $0x50] sm:$0xff] %v2051_v24  ;;  %2068 = vst [vmem:[%s3477_s12 + $0x58] sm:$0xff] %v2052_v44  ;;  %v1997_v3 = vadd.f32 %v1986_v40, %v1971_v1  ;;  %v1998_v25 = vadd.f32 %v1986_v40, %v1972_v8  ;;  %v2010_v2 = vmul.f32 0.1, %v1994_v55 }
 0x5a2   : > { %2069 = vst [vmem:[%s3477_s12 + $0x60] sm:$0xff] %v2053_v21  ;;  %2070 = vst [vmem:[%s3477_s12 + $0x68] sm:$0xff] %v2054_v6  ;;  %v1999_v42 = vadd.f32 %v1986_v40, %v1973_v49  ;;  %v2000_v37 = vadd.f32 %v1986_v40, %v1974_v14  ;;  %v2011_v17 = vmul.f32 0.1, %v1995_v27  ;;  %v2025_v23 = vmax.f32 %v1993_v30, %v2009_v43 }
 0x5a3   : > { %2071 = vst [vmem:[%s3477_s12 + $0x70] sm:$0xff] %v2055_v32  ;;  %2072 = vst [vmem:[%s3477_s12 + $0x78] sm:$0xff] %v2056_v39  ;;  %v2012_v36 = vmul.f32 0.1, %v1996_v33  ;;  %v2013_v54 = vmul.f32 0.1, %v1997_v3  ;;  %v2026_v46 = vmax.f32 %v1994_v55, %v2010_v2 }
 0x5a4   : > { %v2014_v59 = vmul.f32 0.1, %v1998_v25  ;;  %v2015_v16 = vmul.f32 0.1, %v1999_v42  ;;  %v2016_v60 = vmul.f32 0.1, %v2000_v37  ;;  %v2027_v1 = vmax.f32 %v1995_v27, %v2011_v17 }
 0x5a5   : > { %v2028_v8 = vmax.f32 %v1996_v33, %v2012_v36  ;;  %v2029_v49 = vmax.f32 %v1997_v3, %v2013_v54  ;;  %v2041_v53 = vadd.f32 %v2025_v23, %v3609_v61  ;;  %v2042_v52 = vadd.f32 %v2026_v46, %v3610_v10 }
 0x5a6   : > { %v2030_v14 = vmax.f32 %v1998_v25, %v2014_v59  ;;  %v2031_v19 = vmax.f32 %v1999_v42, %v2015_v16  ;;  %v2032_v38 = vmax.f32 %v2000_v37, %v2016_v60  ;;  %v2043_v26 = vadd.f32 %v2027_v1, %v3611_v50 }
 0x5a7   : > { %v2044_v0 = vadd.f32 %v2028_v8, %v3612_v13  ;;  %v2045_v11 = vadd.f32 %v2029_v49, %v3129_v45  ;;  %2057 = vst [vmem:[%s3477_s12] sm:$0xff] %v2041_v53  ;;  %2058 = vst [vmem:[%s3477_s12 + $0x8] sm:$0xff] %v2042_v52 }
 0x5a8   : > { %v2046_v57 = vadd.f32 %v2030_v14, %v3613_v31  ;;  %v2047_v48 = vadd.f32 %v2031_v19, %v3614_v18  ;;  %v2048_v40 = vadd.f32 %v2032_v38, %v3615_v56  ;;  %2059 = vst [vmem:[%s3477_s12 + $0x10] sm:$0xff] %v2043_v26 }
 0x5a9   : > { %2060 = vst [vmem:[%s3477_s12 + $0x18] sm:$0xff] %v2044_v0  ;;  %2061 = vst [vmem:[%s3477_s12 + $0x20] sm:$0xff] %v2045_v11 }
 0x5aa   : > { %2062 = vst [vmem:[%s3477_s12 + $0x28] sm:$0xff] %v2046_v57  ;;  %2063 = vst [vmem:[%s3477_s12 + $0x30] sm:$0xff] %v2047_v48 }
 0x5ab   : > { %2064 = vst [vmem:[%s3477_s12 + $0x38] sm:$0xff] %v2048_v40 }
 0x5ac   : > { %2406 = shalt.err (!%p2403_p4)
}
 0x5ad   : > { %s2407_s18 = scalar_lea.hbm %s3498_s20, 2048  ;;  %s2411_s10 = scalar_lea.hbm %s3560_s7, 4096 }
 0x5ae   : > { %p2408_p9 = scmp.ne.s32.totalorder %s3498_s20, %s2407_s18  ;;  %p2412_p5 = scmp.lt.s32.totalorder %s3498_s20, %s3560_s7 }
 0x5af   : > { %p2413_p8 = scmp.lt.s32.totalorder %s2411_s10, %s2407_s18 }
 0x5b0   : > { %p2409_p11 = pnand %p2408_p9, %p3616_p1 }
 0x5b1   : > { %p2414_p6 = por %p2413_p8, %p2412_p5 }
 0x5b2   : > { %p2410_p3 = pneg %p2409_p11 }
 0x5b4   : > { %p2415_p13 = pnand %p2414_p6, %p2410_p3 }
 0x5b6   : > { %2418 = shalt.err (!%p2415_p13)
}
 0x5b7   : > { %s2472_s17 = smov 1024   ;;  %s2473_s28 = smov 64  }
 0x5b8   : > { %2264 = dma.vmem_to_hbm [thread:$0]  (%p3616_p1), %s3500_s16, 2048, %s3498_s20, %s2074_s21, %s2472_s17, %s2472_s17, %s2473_s28  }
 0x5b9 PF: > { %s2102_s9 = sand.u32 1, %s2449_s24   ;;  %p3617_p12 = scmp.ne.s32.totalorder %s3574_s14, 0 }
 0x5ba   : > { %p3618_p7 = scmp.ge.s32.totalorder %s2461_s27, 2  ;;  %s2103_s23 = scalar_lea.sflag [#allocation4], %s2102_s9 }
 0x5bc   : > { %p2274_p10 = pnand %p3618_p7, %p3617_p12 }
 0x5be   : > { %p2275_p0 = pneg %p2274_p10 }
 0x5c0   : > { %2444 = dma.done.wait (%p2275_p0), %s2103_s23, 2048  }
 0x5c1   : > { %2446 = vsyncadd (%p2275_p0), %s2103_s23, 4294965248  ;;  %s3619_s0 = sld [smem:[#allocation11_spill]]  ;;  %p23_p2 = scmp.ge.s32.totalorder %s2539_s30, 4  }
 0x5c2   : > { %s3620_s24 = smov %s2453_s25  ;;  %s3621_s25 = smov %s2457_s26 }
 0x5c3   : > { %s3623_s27 = smov %s2539_s30  ;;  %25 = sbr.rel (!%p23_p2) target bundleno = 9 (0x9), region = 106 }
 0x5c7   : > { %s3622_s26 = smov %s3619_s0 }
 0x5c8   :  { %2108 = vsyncpa [#allocation3], 1 }
 0x5c9   :  { %2110 = vsyncpa [#allocation3 + $0x1], 1 }
 0x5ca   :  { %2111 = vsyncpa [#allocation6], 1 }
 0x5cb   :  { %2113 = vsyncpa [#allocation6 + $0x1], 1 }
 0x5cc   :  { %2114 = vsyncpa [#allocation4], 1 }
 0x5cd   :  { %2116 = vsyncpa [#allocation4 + $0x1], 1 }

</bundles_post_ra>
